<compile_context>
chip_gen: v6e
topology: v6e:2x2x1
jax: 0.10.0
libtpu: 0.0.40
codegen_flags: <defaults>
</compile_context>

<pallas_src>
import math

import jax
import jax.numpy as jnp
from jax.experimental import pallas as pl
from jax.experimental.pallas import tpu as pltpu

# ----------------------------- config (tiny BERT) -----------------------------
VOCAB = 100
MAX_POS = 16
TYPE_VOCAB = 2
HIDDEN = 32
N_HEADS = 2
HEAD_DIM = HIDDEN // N_HEADS          # 16
N_LAYERS = 2
INTERMEDIATE = 64
NUM_CLASSES = 3
LN_EPS = 1e-12
LOGIT_PAD = 128                       # lane-dense classifier output width

BATCH = 2
SEQ = 8
BS = BATCH * SEQ

# --------------------- packed-slab layout (all offsets static) ----------------
# Embedding-table slab [TAB_ROWS, HIDDEN]; every segment starts 8-sublane aligned.
T_WORD, T_POS, T_TYPE, T_LNG, T_LNB = 0, 104, 120, 128, 136
TAB_ROWS = 144

# Per-layer matmul-weight slab [L, LAYER_W_ROWS, LAYER_W_COLS]; 128-lane blocks.
LAYER_W_ROWS = max(HIDDEN, INTERMEDIATE)       # 64
C_WQ = (0 * 128, 1 * 128)                      # per-head Q (scale pre-folded)
C_WK = (2 * 128, 3 * 128)                      # per-head K
C_WV = (4 * 128, 5 * 128)                      # per-head V
C_WO = 6 * 128                                 # attention output proj [H, H]
C_W1 = 7 * 128                                 # FFN up   [H, I]
C_W2 = 8 * 128                                 # FFN down [I, H]
LAYER_W_COLS = 9 * 128                         # 1152

# Per-layer bias / LayerNorm slab [L, 1, LAYER_V_COLS]; 128-lane blocks.
V_BQ = (0 * 128, 1 * 128)
V_BK = (2 * 128, 3 * 128)
V_BV = (4 * 128, 5 * 128)
V_BO = 6 * 128
V_B1 = 7 * 128
V_B2 = 8 * 128
V_LN1G, V_LN1B = 9 * 128, 10 * 128
V_LN2G, V_LN2B = 11 * 128, 12 * 128
LAYER_V_COLS = 13 * 128                        # 1664

# Pooler + classifier slab [HEAD_ROWS, HEAD_COLS].
HEAD_ROWS, HEAD_COLS = 40, 256
H_FC_COL = 128                                 # fc weights/bias live in lanes 128:256


# ----------------------------- fused Pallas kernel ----------------------------
def _bert_fused_kernel(
    ids_ref,       # [BS, 1]  int32 token ids
    mask_ref,      # [B, 1, S] int32 attention mask (1 = valid, 0 = pad)
    tab_ref,       # [TAB_ROWS, H]      word/pos/type tables + embedding LN
    layer_w_ref,   # [L, 64, 1152]      per-layer matmul weights (aligned blocks)
    layer_v_ref,   # [L, 1, 1664]       per-layer biases + LayerNorm params
    head_ref,      # [40, 256]          pooler + classifier (fc padded to 128)
    out_ref,       # [BS, LOGIT_PAD]
):
    f32 = jnp.float32

    def layer_norm(x, g, b):
        mean = jnp.mean(x, axis=-1, keepdims=True)
        xc = x - mean
        var = jnp.mean(xc * xc, axis=-1, keepdims=True)
        return xc * jax.lax.rsqrt(var + LN_EPS) * g + b

    def gelu(x):
        # tanh-approximate GELU; ~1e-3 from the exact erf GELU of stock BERT.
        # TODO(synk): switch to exact erf GELU if bit-level parity is required.
        return 0.5 * x * (1.0 + jnp.tanh(0.7978845608028654 * (x + 0.044715 * x * x * x)))

    # ---- embeddings: in-kernel gather via one-hot MXU matmul (no XLA glue) ----
    ids = ids_ref[...]                                                   # [BS, 1]
    vocab_iota = jax.lax.broadcasted_iota(jnp.int32, (BS, VOCAB), 1)
    onehot = (vocab_iota == ids).astype(f32)                             # [BS, VOCAB]
    word = jnp.dot(onehot, tab_ref[T_WORD:T_WORD + VOCAB, :],
                   preferred_element_type=f32)                           # [BS, H]
    pos = jnp.tile(tab_ref[T_POS:T_POS + SEQ, :], (BATCH, 1))            # [BS, H]
    typ = tab_ref[T_TYPE:T_TYPE + 1, :]                                  # token_type_ids == 0

    x = layer_norm(word + pos + typ,
                   tab_ref[T_LNG:T_LNG + 1, :], tab_ref[T_LNB:T_LNB + 1, :])   # [BS, H]

    # ---- additive attention mask, built once and hoisted out of all loops ----
    mask_bias = (1.0 - mask_ref[...].astype(f32)) * -1e9                 # [B, 1, S]

    # ---- transformer encoder layers (statically unrolled, weights resident) ----
    for l in range(N_LAYERS):
        def wmat(col, rows, width, _l=l):
            return layer_w_ref[_l, 0:rows, col:col + width]

        def vvec(col, width, _l=l):
            return layer_v_ref[_l, :, col:col + width]                   # [1, width]

        # attention: per-head ref-sliced weights, batched einsums over B,
        # batched softmax over [B, S, S]; head outputs accumulated via Wo rows
        # (no value-level lane slicing, no concatenation).
        attn = vvec(V_BO, HIDDEN)                                        # [1, H] (output bias)
        for h in range(N_HEADS):
            q = jnp.dot(x, wmat(C_WQ[h], HIDDEN, HEAD_DIM),
                        preferred_element_type=f32) + vvec(V_BQ[h], HEAD_DIM)
            k = jnp.dot(x, wmat(C_WK[h], HIDDEN, HEAD_DIM),
                        preferred_element_type=f32) + vvec(V_BK[h], HEAD_DIM)
            v = jnp.dot(x, wmat(C_WV[h], HIDDEN, HEAD_DIM),
                        preferred_element_type=f32) + vvec(V_BV[h], HEAD_DIM)
            q3 = q.reshape(BATCH, SEQ, HEAD_DIM)       # sublane-group split: layout-free
            k3 = k.reshape(BATCH, SEQ, HEAD_DIM)
            v3 = v.reshape(BATCH, SEQ, HEAD_DIM)

            # 1/sqrt(HEAD_DIM) is pre-folded into Wq / bq at init time.
            s = jnp.einsum('bqd,bkd->bqk', q3, k3,
                           preferred_element_type=f32) + mask_bias       # [B, S, S]
            s = s - jnp.max(s, axis=-1, keepdims=True)
            p = jnp.exp(s)
            p = p / jnp.sum(p, axis=-1, keepdims=True)

            ctx = jnp.einsum('bqk,bkd->bqd', p, v3,
                             preferred_element_type=f32)                 # [B, S, Dh]
            attn = attn + jnp.dot(
                ctx.reshape(BS, HEAD_DIM),
                layer_w_ref[l, h * HEAD_DIM:(h + 1) * HEAD_DIM, C_WO:C_WO + HIDDEN],
                preferred_element_type=f32)                              # [BS, H]

        x1 = layer_norm(attn + x, vvec(V_LN1G, HIDDEN), vvec(V_LN1B, HIDDEN))

        # feed-forward + residual + LayerNorm
        ff = gelu(jnp.dot(x1, wmat(C_W1, HIDDEN, INTERMEDIATE),
                          preferred_element_type=f32) + vvec(V_B1, INTERMEDIATE))
        ff = jnp.dot(ff, wmat(C_W2, INTERMEDIATE, HIDDEN),
                     preferred_element_type=f32) + vvec(V_B2, HIDDEN)
        x = layer_norm(ff + x1, vvec(V_LN2G, HIDDEN), vvec(V_LN2B, HIDDEN))

    # ---- pooler (dense + tanh) on ALL rows: avoids a CLS-extraction shuffle and
    #      costs nothing extra on the MXU; the wrapper keeps rows b*SEQ ([CLS]).
    pooled = jnp.tanh(
        jnp.dot(x, head_ref[0:HIDDEN, 0:HIDDEN], preferred_element_type=f32)
        + head_ref[HIDDEN:HIDDEN + 1, 0:HIDDEN])

    # dropout(p=0.1): inference/eval mode -> identity
    # TODO(synk): training-mode dropout (Bernoulli mask via pltpu.prng_*) not implemented.

    # ---- classifier head: full (16,128) lane-dense tile store (unmasked vst) ----
    out_ref[...] = (
        jnp.dot(pooled, head_ref[0:HIDDEN, H_FC_COL:H_FC_COL + LOGIT_PAD],
                preferred_element_type=f32)
        + head_ref[HIDDEN:HIDDEN + 1, H_FC_COL:H_FC_COL + LOGIT_PAD])


# ----------------------------- parameter init ---------------------------------
def init_params(key):
    L, H, I, Dh = N_LAYERS, HIDDEN, INTERMEDIATE, HEAD_DIM
    ks = iter(jax.random.split(key, 24))

    def nrm(shape, scale=0.02):
        return scale * jax.random.normal(next(ks), shape, dtype=jnp.float32)

    word_emb = nrm((VOCAB, H))
    pos_emb = nrm((MAX_POS, H))
    type_emb = nrm((TYPE_VOCAB, H))
    emb_ln_g = jnp.ones((H,), jnp.float32)
    emb_ln_b = jnp.zeros((H,), jnp.float32)

    wq, wk, wv, wo = nrm((L, H, H)), nrm((L, H, H)), nrm((L, H, H)), nrm((L, H, H))
    bq, bk, bv, bo = nrm((L, H)), nrm((L, H)), nrm((L, H)), nrm((L, H))
    w1, b1 = nrm((L, H, I)), nrm((L, I))
    w2, b2 = nrm((L, I, H)), nrm((L, H))
    ln1_g, ln1_b = jnp.ones((L, H), jnp.float32), jnp.zeros((L, H), jnp.float32)
    ln2_g, ln2_b = jnp.ones((L, H), jnp.float32), jnp.zeros((L, H), jnp.float32)
    pooler_w, pooler_b = nrm((H, H)), nrm((H,))
    fc_w, fc_b = nrm((H, NUM_CLASSES)), jnp.zeros((NUM_CLASSES,), jnp.float32)

    # ---- embedding-table slab ----
    tables = jnp.zeros((TAB_ROWS, H), jnp.float32)
    tables = tables.at[T_WORD:T_WORD + VOCAB].set(word_emb)
    tables = tables.at[T_POS:T_POS + MAX_POS].set(pos_emb)
    tables = tables.at[T_TYPE:T_TYPE + TYPE_VOCAB].set(type_emb)
    tables = tables.at[T_LNG].set(emb_ln_g)
    tables = tables.at[T_LNB].set(emb_ln_b)

    # ---- per-layer weight / vector slabs (Q scale folded in at init) ----
    scale = 1.0 / math.sqrt(Dh)
    layer_w = jnp.zeros((L, LAYER_W_ROWS, LAYER_W_COLS), jnp.float32)
    layer_v = jnp.zeros((L, 1, LAYER_V_COLS), jnp.float32)
    for h in range(N_HEADS):
        cols = slice(h * Dh, (h + 1) * Dh)
        layer_w = layer_w.at[:, 0:H, C_WQ[h]:C_WQ[h] + Dh].set(wq[:, :, cols] * scale)
        layer_w = layer_w.at[:, 0:H, C_WK[h]:C_WK[h] + Dh].set(wk[:, :, cols])
        layer_w = layer_w.at[:, 0:H, C_WV[h]:C_WV[h] + Dh].set(wv[:, :, cols])
        layer_v = layer_v.at[:, 0, V_BQ[h]:V_BQ[h] + Dh].set(bq[:, cols] * scale)
        layer_v = layer_v.at[:, 0, V_BK[h]:V_BK[h] + Dh].set(bk[:, cols])
        layer_v = layer_v.at[:, 0, V_BV[h]:V_BV[h] + Dh].set(bv[:, cols])
    layer_w = layer_w.at[:, 0:H, C_WO:C_WO + H].set(wo)
    layer_w = layer_w.at[:, 0:H, C_W1:C_W1 + I].set(w1)
    layer_w = layer_w.at[:, 0:I, C_W2:C_W2 + H].set(w2)
    layer_v = layer_v.at[:, 0, V_BO:V_BO + H].set(bo)
    layer_v = layer_v.at[:, 0, V_B1:V_B1 + I].set(b1)
    layer_v = layer_v.at[:, 0, V_B2:V_B2 + H].set(b2)
    layer_v = layer_v.at[:, 0, V_LN1G:V_LN1G + H].set(ln1_g)
    layer_v = layer_v.at[:, 0, V_LN1B:V_LN1B + H].set(ln1_b)
    layer_v = layer_v.at[:, 0, V_LN2G:V_LN2G + H].set(ln2_g)
    layer_v = layer_v.at[:, 0, V_LN2B:V_LN2B + H].set(ln2_b)

    # ---- pooler + classifier slab (fc padded lane-dense to LOGIT_PAD) ----
    head = jnp.zeros((HEAD_ROWS, HEAD_COLS), jnp.float32)
    head = head.at[0:H, 0:H].set(pooler_w)
    head = head.at[H, 0:H].set(pooler_b)
    head = head.at[0:H, H_FC_COL:H_FC_COL + NUM_CLASSES].set(fc_w)
    head = head.at[H, H_FC_COL:H_FC_COL + NUM_CLASSES].set(fc_b)

    return {"tables": tables, "layer_w": layer_w, "layer_v": layer_v, "head": head}


# ----------------------------- forward pass ------------------------------------
def bert_classifier_forward(params, input_ids, attention_mask):
    B, S = input_ids.shape
    assert (B, S) == (BATCH, SEQ), "kernel is specialized to (BATCH, SEQ)"

    ids = input_ids.reshape(B * S, 1).astype(jnp.int32)        # metadata reshape only
    mask = attention_mask.reshape(B, 1, S).astype(jnp.int32)   # mask math happens in-kernel

    inputs = (ids, mask, params["tables"], params["layer_w"],
              params["layer_v"], params["head"])

    # Single fused, gridless pallas_call: 6 VMEM-resident operands (<1 MiB total),
    # one DMA each; everything else happens inside the kernel.
    logits_pad = pl.pallas_call(
        _bert_fused_kernel,
        out_shape=jax.ShapeDtypeStruct((B * S, LOGIT_PAD), jnp.float32),
        in_specs=[pl.BlockSpec(memory_space=pltpu.MemorySpace.VMEM) for _ in inputs],
        out_specs=pl.BlockSpec(memory_space=pltpu.MemorySpace.VMEM),
    )(*inputs)

    # rows b*SEQ hold the [CLS] logits; first NUM_CLASSES lanes are the real classes
    return logits_pad[0::S, :NUM_CLASSES]


# ----------------------------- main --------------------------------------------
if __name__ == "__main__":
    key = jax.random.PRNGKey(0)
    pkey, ikey = jax.random.split(key)

    params = init_params(pkey)

    input_ids = jax.random.randint(ikey, (BATCH, SEQ), 0, VOCAB, dtype=jnp.int32)
    # batch 0 fully valid; batch 1 has 2 padding positions at the end
    attention_mask = jnp.array(
        [[1, 1, 1, 1, 1, 1, 1, 1],
         [1, 1, 1, 1, 1, 1, 0, 0]], dtype=jnp.int32)

    forward = jax.jit(bert_classifier_forward)
    logits = jax.block_until_ready(forward(params, input_ids, attention_mask))

    assert logits.shape == (BATCH, NUM_CLASSES), logits.shape
    assert bool(jnp.all(jnp.isfinite(logits)))
    print("KERNEL_OK")
</pallas_src>

<mosaic_0001>
module attributes {stable_mosaic.version = 11 : i64} {
  func.func @_bert_fused_kernel(%arg0: memref<16x1xi32, #tpu.memory_space<vmem>>, %arg1: memref<2x1x8xi32, #tpu.memory_space<vmem>>, %arg2: memref<144x32xf32, #tpu.memory_space<vmem>>, %arg3: memref<2x64x1152xf32, #tpu.memory_space<vmem>>, %arg4: memref<2x1x1664xf32, #tpu.memory_space<vmem>>, %arg5: memref<40x256xf32, #tpu.memory_space<vmem>>, %arg6: memref<16x128xf32, #tpu.memory_space<vmem>>) attributes {dimension_semantics = [], scalar_prefetch = 0 : i64, scratch_operands = 0 : i64, tpu.core_type = #tpu.core_type<tc>} {
    %c0 = arith.constant 0 : index
    %c0_0 = arith.constant 0 : index
    %0 = vector.load %arg0[%c0, %c0_0] : memref<16x1xi32, #tpu.memory_space<vmem>>, vector<16x1xi32>
    %1 = tpu.iota {dimensions = array<i32: 1>} : vector<16x100xi32>
    %2 = vector.broadcast %0 : vector<16x1xi32> to vector<16x100xi32>
    %3 = arith.cmpi eq, %1, %2 : vector<16x100xi32>
    %4 = arith.extui %3 : vector<16x100xi1> to vector<16x100xi32>
    %5 = arith.sitofp %4 : vector<16x100xi32> to vector<16x100xf32>
    %c0_1 = arith.constant 0 : index
    %c0_2 = arith.constant 0 : index
    %6 = vector.load %arg2[%c0_1, %c0_2] : memref<144x32xf32, #tpu.memory_space<vmem>>, vector<100x32xf32>
    %cst = arith.constant dense<0.000000e+00> : vector<16x32xf32>
    %7 = tpu.matmul %5, %6, %cst {dimension_numbers = #tpu.dot_dimension_numbers<[1], [0], [0], [1], [0, 0, 1, 1], [], []>} : vector<16x100xf32>, vector<100x32xf32>, vector<16x32xf32> -> vector<16x32xf32>
    %c104 = arith.constant 104 : index
    %c0_3 = arith.constant 0 : index
    %8 = vector.load %arg2[%c104, %c0_3] : memref<144x32xf32, #tpu.memory_space<vmem>>, vector<8x32xf32>
    %9 = tpu.concatenate %8, %8 in 0 : vector<8x32xf32>, vector<8x32xf32> -> vector<16x32xf32>
    %c120 = arith.constant 120 : index
    %c0_4 = arith.constant 0 : index
    %10 = vector.load %arg2[%c120, %c0_4] : memref<144x32xf32, #tpu.memory_space<vmem>>, vector<1x32xf32>
    %11 = arith.addf %7, %9 : vector<16x32xf32>
    %12 = vector.broadcast %10 : vector<1x32xf32> to vector<16x32xf32>
    %13 = arith.addf %11, %12 : vector<16x32xf32>
    %c128 = arith.constant 128 : index
    %c0_5 = arith.constant 0 : index
    %14 = vector.load %arg2[%c128, %c0_5] : memref<144x32xf32, #tpu.memory_space<vmem>>, vector<1x32xf32>
    %c136 = arith.constant 136 : index
    %c0_6 = arith.constant 0 : index
    %15 = vector.load %arg2[%c136, %c0_6] : memref<144x32xf32, #tpu.memory_space<vmem>>, vector<1x32xf32>
    %cst_7 = arith.constant dense<0.000000e+00> : vector<16xf32>
    %16 = vector.multi_reduction <add>, %13, %cst_7 [1] : vector<16x32xf32> to vector<16xf32>
    %17 = vector.shape_cast %16 : vector<16xf32> to vector<16x1xf32>
    %cst_8 = arith.constant 3.200000e+01 : f32
    %18 = vector.broadcast %cst_8 : f32 to vector<16x1xf32>
    %19 = arith.divf %17, %18 : vector<16x1xf32>
    %20 = vector.broadcast %19 : vector<16x1xf32> to vector<16x32xf32>
    %21 = arith.subf %13, %20 : vector<16x32xf32>
    %22 = arith.mulf %21, %21 : vector<16x32xf32>
    %cst_9 = arith.constant dense<0.000000e+00> : vector<16xf32>
    %23 = vector.multi_reduction <add>, %22, %cst_9 [1] : vector<16x32xf32> to vector<16xf32>
    %24 = vector.shape_cast %23 : vector<16xf32> to vector<16x1xf32>
    %cst_10 = arith.constant 3.200000e+01 : f32
    %25 = vector.broadcast %cst_10 : f32 to vector<16x1xf32>
    %26 = arith.divf %24, %25 : vector<16x1xf32>
    %cst_11 = arith.constant 9.99999996E-13 : f32
    %27 = vector.broadcast %cst_11 : f32 to vector<16x1xf32>
    %28 = arith.addf %26, %27 : vector<16x1xf32>
    %29 = math.rsqrt %28 : vector<16x1xf32>
    %30 = vector.broadcast %29 : vector<16x1xf32> to vector<16x32xf32>
    %31 = arith.mulf %21, %30 : vector<16x32xf32>
    %32 = vector.broadcast %14 : vector<1x32xf32> to vector<16x32xf32>
    %33 = arith.mulf %31, %32 : vector<16x32xf32>
    %34 = vector.broadcast %15 : vector<1x32xf32> to vector<16x32xf32>
    %35 = arith.addf %33, %34 : vector<16x32xf32>
    %c0_12 = arith.constant 0 : index
    %c0_13 = arith.constant 0 : index
    %c0_14 = arith.constant 0 : index
    %36 = vector.load %arg1[%c0_12, %c0_13, %c0_14] : memref<2x1x8xi32, #tpu.memory_space<vmem>>, vector<2x1x8xi32>
    %37 = arith.sitofp %36 : vector<2x1x8xi32> to vector<2x1x8xf32>
    %cst_15 = arith.constant 1.000000e+00 : f32
    %38 = vector.broadcast %cst_15 : f32 to vector<2x1x8xf32>
    %39 = arith.subf %38, %37 : vector<2x1x8xf32>
    %cst_16 = arith.constant -1.000000e+09 : f32
    %40 = vector.broadcast %cst_16 : f32 to vector<2x1x8xf32>
    %41 = arith.mulf %39, %40 : vector<2x1x8xf32>
    %c0_17 = arith.constant 0 : index
    %c0_18 = arith.constant 0 : index
    %c768 = arith.constant 768 : index
    %42 = vector.load %arg4[%c0_17, %c0_18, %c768] : memref<2x1x1664xf32, #tpu.memory_space<vmem>>, vector<1x1x32xf32>
    %43 = vector.shape_cast %42 : vector<1x1x32xf32> to vector<1x32xf32>
    %c0_19 = arith.constant 0 : index
    %c0_20 = arith.constant 0 : index
    %c0_21 = arith.constant 0 : index
    %44 = vector.load %arg3[%c0_19, %c0_20, %c0_21] : memref<2x64x1152xf32, #tpu.memory_space<vmem>>, vector<1x32x16xf32>
    %45 = vector.shape_cast %44 : vector<1x32x16xf32> to vector<32x16xf32>
    %cst_22 = arith.constant dense<0.000000e+00> : vector<16x16xf32>
    %46 = tpu.matmul %35, %45, %cst_22 {dimension_numbers = #tpu.dot_dimension_numbers<[1], [0], [0], [1], [0, 0, 1, 1], [], []>} : vector<16x32xf32>, vector<32x16xf32>, vector<16x16xf32> -> vector<16x16xf32>
    %c0_23 = arith.constant 0 : index
    %c0_24 = arith.constant 0 : index
    %c0_25 = arith.constant 0 : index
    %47 = vector.load %arg4[%c0_23, %c0_24, %c0_25] : memref<2x1x1664xf32, #tpu.memory_space<vmem>>, vector<1x1x16xf32>
    %48 = vector.shape_cast %47 : vector<1x1x16xf32> to vector<1x16xf32>
    %49 = vector.broadcast %48 : vector<1x16xf32> to vector<16x16xf32>
    %50 = arith.addf %46, %49 : vector<16x16xf32>
    %c0_26 = arith.constant 0 : index
    %c0_27 = arith.constant 0 : index
    %c256 = arith.constant 256 : index
    %51 = vector.load %arg3[%c0_26, %c0_27, %c256] : memref<2x64x1152xf32, #tpu.memory_space<vmem>>, vector<1x32x16xf32>
    %52 = vector.shape_cast %51 : vector<1x32x16xf32> to vector<32x16xf32>
    %cst_28 = arith.constant dense<0.000000e+00> : vector<16x16xf32>
    %53 = tpu.matmul %35, %52, %cst_28 {dimension_numbers = #tpu.dot_dimension_numbers<[1], [0], [0], [1], [0, 0, 1, 1], [], []>} : vector<16x32xf32>, vector<32x16xf32>, vector<16x16xf32> -> vector<16x16xf32>
    %c0_29 = arith.constant 0 : index
    %c0_30 = arith.constant 0 : index
    %c256_31 = arith.constant 256 : index
    %54 = vector.load %arg4[%c0_29, %c0_30, %c256_31] : memref<2x1x1664xf32, #tpu.memory_space<vmem>>, vector<1x1x16xf32>
    %55 = vector.shape_cast %54 : vector<1x1x16xf32> to vector<1x16xf32>
    %56 = vector.broadcast %55 : vector<1x16xf32> to vector<16x16xf32>
    %57 = arith.addf %53, %56 : vector<16x16xf32>
    %c0_32 = arith.constant 0 : index
    %c0_33 = arith.constant 0 : index
    %c512 = arith.constant 512 : index
    %58 = vector.load %arg3[%c0_32, %c0_33, %c512] : memref<2x64x1152xf32, #tpu.memory_space<vmem>>, vector<1x32x16xf32>
    %59 = vector.shape_cast %58 : vector<1x32x16xf32> to vector<32x16xf32>
    %cst_34 = arith.constant dense<0.000000e+00> : vector<16x16xf32>
    %60 = tpu.matmul %35, %59, %cst_34 {dimension_numbers = #tpu.dot_dimension_numbers<[1], [0], [0], [1], [0, 0, 1, 1], [], []>} : vector<16x32xf32>, vector<32x16xf32>, vector<16x16xf32> -> vector<16x16xf32>
    %c0_35 = arith.constant 0 : index
    %c0_36 = arith.constant 0 : index
    %c512_37 = arith.constant 512 : index
    %61 = vector.load %arg4[%c0_35, %c0_36, %c512_37] : memref<2x1x1664xf32, #tpu.memory_space<vmem>>, vector<1x1x16xf32>
    %62 = vector.shape_cast %61 : vector<1x1x16xf32> to vector<1x16xf32>
    %63 = vector.broadcast %62 : vector<1x16xf32> to vector<16x16xf32>
    %64 = arith.addf %60, %63 : vector<16x16xf32>
    %65 = vector.shape_cast %50 : vector<16x16xf32> to vector<2x8x16xf32>
    %66 = vector.shape_cast %57 : vector<16x16xf32> to vector<2x8x16xf32>
    %67 = vector.shape_cast %64 : vector<16x16xf32> to vector<2x8x16xf32>
    "tpu.trace_start"() <{level = 10 : i32, message = "bqd,bkd->bqk"}> : () -> ()
    %cst_38 = arith.constant dense<0.000000e+00> : vector<2x8x8xf32>
    %68 = tpu.matmul %65, %66, %cst_38 {dimension_numbers = #tpu.dot_dimension_numbers<[2], [2], [1], [1], [0, 0, 0, 1, 1, 1], [0], [0]>} : vector<2x8x16xf32>, vector<2x8x16xf32>, vector<2x8x8xf32> -> vector<2x8x8xf32>
    "tpu.trace_stop"() : () -> ()
    %69 = vector.broadcast %41 : vector<2x1x8xf32> to vector<2x8x8xf32>
    %70 = arith.addf %68, %69 : vector<2x8x8xf32>
    %cst_39 = arith.constant dense<0xFF800000> : vector<2x8xf32>
    %71 = vector.multi_reduction <maximumf>, %70, %cst_39 [2] : vector<2x8x8xf32> to vector<2x8xf32>
    %72 = vector.shape_cast %71 : vector<2x8xf32> to vector<2x8x1xf32>
    %73 = vector.broadcast %72 : vector<2x8x1xf32> to vector<2x8x8xf32>
    %74 = arith.subf %70, %73 : vector<2x8x8xf32>
    %75 = math.exp %74 : vector<2x8x8xf32>
    %cst_40 = arith.constant dense<0.000000e+00> : vector<2x8xf32>
    %76 = vector.multi_reduction <add>, %75, %cst_40 [2] : vector<2x8x8xf32> to vector<2x8xf32>
    %77 = vector.shape_cast %76 : vector<2x8xf32> to vector<2x8x1xf32>
    %78 = vector.broadcast %77 : vector<2x8x1xf32> to vector<2x8x8xf32>
    %79 = arith.divf %75, %78 : vector<2x8x8xf32>
    "tpu.trace_start"() <{level = 10 : i32, message = "bqk,bkd->bqd"}> : () -> ()
    %cst_41 = arith.constant dense<0.000000e+00> : vector<2x8x16xf32>
    %80 = tpu.matmul %79, %67, %cst_41 {dimension_numbers = #tpu.dot_dimension_numbers<[2], [1], [1], [2], [0, 0, 0, 1, 1, 2], [0], [0]>} : vector<2x8x8xf32>, vector<2x8x16xf32>, vector<2x8x16xf32> -> vector<2x8x16xf32>
    "tpu.trace_stop"() : () -> ()
    %81 = vector.shape_cast %80 : vector<2x8x16xf32> to vector<16x16xf32>
    %c0_42 = arith.constant 0 : index
    %c0_43 = arith.constant 0 : index
    %c768_44 = arith.constant 768 : index
    %82 = vector.load %arg3[%c0_42, %c0_43, %c768_44] : memref<2x64x1152xf32, #tpu.memory_space<vmem>>, vector<1x16x32xf32>
    %83 = vector.shape_cast %82 : vector<1x16x32xf32> to vector<16x32xf32>
    %cst_45 = arith.constant dense<0.000000e+00> : vector<16x32xf32>
    %84 = tpu.matmul %81, %83, %cst_45 {dimension_numbers = #tpu.dot_dimension_numbers<[1], [0], [0], [1], [0, 0, 1, 1], [], []>} : vector<16x16xf32>, vector<16x32xf32>, vector<16x32xf32> -> vector<16x32xf32>
    %85 = vector.broadcast %43 : vector<1x32xf32> to vector<16x32xf32>
    %86 = arith.addf %85, %84 : vector<16x32xf32>
    %c0_46 = arith.constant 0 : index
    %c0_47 = arith.constant 0 : index
    %c128_48 = arith.constant 128 : index
    %87 = vector.load %arg3[%c0_46, %c0_47, %c128_48] : memref<2x64x1152xf32, #tpu.memory_space<vmem>>, vector<1x32x16xf32>
    %88 = vector.shape_cast %87 : vector<1x32x16xf32> to vector<32x16xf32>
    %cst_49 = arith.constant dense<0.000000e+00> : vector<16x16xf32>
    %89 = tpu.matmul %35, %88, %cst_49 {dimension_numbers = #tpu.dot_dimension_numbers<[1], [0], [0], [1], [0, 0, 1, 1], [], []>} : vector<16x32xf32>, vector<32x16xf32>, vector<16x16xf32> -> vector<16x16xf32>
    %c0_50 = arith.constant 0 : index
    %c0_51 = arith.constant 0 : index
    %c128_52 = arith.constant 128 : index
    %90 = vector.load %arg4[%c0_50, %c0_51, %c128_52] : memref<2x1x1664xf32, #tpu.memory_space<vmem>>, vector<1x1x16xf32>
    %91 = vector.shape_cast %90 : vector<1x1x16xf32> to vector<1x16xf32>
    %92 = vector.broadcast %91 : vector<1x16xf32> to vector<16x16xf32>
    %93 = arith.addf %89, %92 : vector<16x16xf32>
    %c0_53 = arith.constant 0 : index
    %c0_54 = arith.constant 0 : index
    %c384 = arith.constant 384 : index
    %94 = vector.load %arg3[%c0_53, %c0_54, %c384] : memref<2x64x1152xf32, #tpu.memory_space<vmem>>, vector<1x32x16xf32>
    %95 = vector.shape_cast %94 : vector<1x32x16xf32> to vector<32x16xf32>
    %cst_55 = arith.constant dense<0.000000e+00> : vector<16x16xf32>
    %96 = tpu.matmul %35, %95, %cst_55 {dimension_numbers = #tpu.dot_dimension_numbers<[1], [0], [0], [1], [0, 0, 1, 1], [], []>} : vector<16x32xf32>, vector<32x16xf32>, vector<16x16xf32> -> vector<16x16xf32>
    %c0_56 = arith.constant 0 : index
    %c0_57 = arith.constant 0 : index
    %c384_58 = arith.constant 384 : index
    %97 = vector.load %arg4[%c0_56, %c0_57, %c384_58] : memref<2x1x1664xf32, #tpu.memory_space<vmem>>, vector<1x1x16xf32>
    %98 = vector.shape_cast %97 : vector<1x1x16xf32> to vector<1x16xf32>
    %99 = vector.broadcast %98 : vector<1x16xf32> to vector<16x16xf32>
    %100 = arith.addf %96, %99 : vector<16x16xf32>
    %c0_59 = arith.constant 0 : index
    %c0_60 = arith.constant 0 : index
    %c640 = arith.constant 640 : index
    %101 = vector.load %arg3[%c0_59, %c0_60, %c640] : memref<2x64x1152xf32, #tpu.memory_space<vmem>>, vector<1x32x16xf32>
    %102 = vector.shape_cast %101 : vector<1x32x16xf32> to vector<32x16xf32>
    %cst_61 = arith.constant dense<0.000000e+00> : vector<16x16xf32>
    %103 = tpu.matmul %35, %102, %cst_61 {dimension_numbers = #tpu.dot_dimension_numbers<[1], [0], [0], [1], [0, 0, 1, 1], [], []>} : vector<16x32xf32>, vector<32x16xf32>, vector<16x16xf32> -> vector<16x16xf32>
    %c0_62 = arith.constant 0 : index
    %c0_63 = arith.constant 0 : index
    %c640_64 = arith.constant 640 : index
    %104 = vector.load %arg4[%c0_62, %c0_63, %c640_64] : memref<2x1x1664xf32, #tpu.memory_space<vmem>>, vector<1x1x16xf32>
    %105 = vector.shape_cast %104 : vector<1x1x16xf32> to vector<1x16xf32>
    %106 = vector.broadcast %105 : vector<1x16xf32> to vector<16x16xf32>
    %107 = arith.addf %103, %106 : vector<16x16xf32>
    %108 = vector.shape_cast %93 : vector<16x16xf32> to vector<2x8x16xf32>
    %109 = vector.shape_cast %100 : vector<16x16xf32> to vector<2x8x16xf32>
    %110 = vector.shape_cast %107 : vector<16x16xf32> to vector<2x8x16xf32>
    "tpu.trace_start"() <{level = 10 : i32, message = "bqd,bkd->bqk"}> : () -> ()
    %cst_65 = arith.constant dense<0.000000e+00> : vector<2x8x8xf32>
    %111 = tpu.matmul %108, %109, %cst_65 {dimension_numbers = #tpu.dot_dimension_numbers<[2], [2], [1], [1], [0, 0, 0, 1, 1, 1], [0], [0]>} : vector<2x8x16xf32>, vector<2x8x16xf32>, vector<2x8x8xf32> -> vector<2x8x8xf32>
    "tpu.trace_stop"() : () -> ()
    %112 = vector.broadcast %41 : vector<2x1x8xf32> to vector<2x8x8xf32>
    %113 = arith.addf %111, %112 : vector<2x8x8xf32>
    %cst_66 = arith.constant dense<0xFF800000> : vector<2x8xf32>
    %114 = vector.multi_reduction <maximumf>, %113, %cst_66 [2] : vector<2x8x8xf32> to vector<2x8xf32>
    %115 = vector.shape_cast %114 : vector<2x8xf32> to vector<2x8x1xf32>
    %116 = vector.broadcast %115 : vector<2x8x1xf32> to vector<2x8x8xf32>
    %117 = arith.subf %113, %116 : vector<2x8x8xf32>
    %118 = math.exp %117 : vector<2x8x8xf32>
    %cst_67 = arith.constant dense<0.000000e+00> : vector<2x8xf32>
    %119 = vector.multi_reduction <add>, %118, %cst_67 [2] : vector<2x8x8xf32> to vector<2x8xf32>
    %120 = vector.shape_cast %119 : vector<2x8xf32> to vector<2x8x1xf32>
    %121 = vector.broadcast %120 : vector<2x8x1xf32> to vector<2x8x8xf32>
    %122 = arith.divf %118, %121 : vector<2x8x8xf32>
    "tpu.trace_start"() <{level = 10 : i32, message = "bqk,bkd->bqd"}> : () -> ()
    %cst_68 = arith.constant dense<0.000000e+00> : vector<2x8x16xf32>
    %123 = tpu.matmul %122, %110, %cst_68 {dimension_numbers = #tpu.dot_dimension_numbers<[2], [1], [1], [2], [0, 0, 0, 1, 1, 2], [0], [0]>} : vector<2x8x8xf32>, vector<2x8x16xf32>, vector<2x8x16xf32> -> vector<2x8x16xf32>
    "tpu.trace_stop"() : () -> ()
    %124 = vector.shape_cast %123 : vector<2x8x16xf32> to vector<16x16xf32>
    %c0_69 = arith.constant 0 : index
    %c16 = arith.constant 16 : index
    %c768_70 = arith.constant 768 : index
    %125 = vector.load %arg3[%c0_69, %c16, %c768_70] : memref<2x64x1152xf32, #tpu.memory_space<vmem>>, vector<1x16x32xf32>
    %126 = vector.shape_cast %125 : vector<1x16x32xf32> to vector<16x32xf32>
    %cst_71 = arith.constant dense<0.000000e+00> : vector<16x32xf32>
    %127 = tpu.matmul %124, %126, %cst_71 {dimension_numbers = #tpu.dot_dimension_numbers<[1], [0], [0], [1], [0, 0, 1, 1], [], []>} : vector<16x16xf32>, vector<16x32xf32>, vector<16x32xf32> -> vector<16x32xf32>
    %128 = arith.addf %86, %127 : vector<16x32xf32>
    %129 = arith.addf %128, %35 : vector<16x32xf32>
    %c0_72 = arith.constant 0 : index
    %c0_73 = arith.constant 0 : index
    %c1152 = arith.constant 1152 : index
    %130 = vector.load %arg4[%c0_72, %c0_73, %c1152] : memref<2x1x1664xf32, #tpu.memory_space<vmem>>, vector<1x1x32xf32>
    %131 = vector.shape_cast %130 : vector<1x1x32xf32> to vector<1x32xf32>
    %c0_74 = arith.constant 0 : index
    %c0_75 = arith.constant 0 : index
    %c1280 = arith.constant 1280 : index
    %132 = vector.load %arg4[%c0_74, %c0_75, %c1280] : memref<2x1x1664xf32, #tpu.memory_space<vmem>>, vector<1x1x32xf32>
    %133 = vector.shape_cast %132 : vector<1x1x32xf32> to vector<1x32xf32>
    %cst_76 = arith.constant dense<0.000000e+00> : vector<16xf32>
    %134 = vector.multi_reduction <add>, %129, %cst_76 [1] : vector<16x32xf32> to vector<16xf32>
    %135 = vector.shape_cast %134 : vector<16xf32> to vector<16x1xf32>
    %cst_77 = arith.constant 3.200000e+01 : f32
    %136 = vector.broadcast %cst_77 : f32 to vector<16x1xf32>
    %137 = arith.divf %135, %136 : vector<16x1xf32>
    %138 = vector.broadcast %137 : vector<16x1xf32> to vector<16x32xf32>
    %139 = arith.subf %129, %138 : vector<16x32xf32>
    %140 = arith.mulf %139, %139 : vector<16x32xf32>
    %cst_78 = arith.constant dense<0.000000e+00> : vector<16xf32>
    %141 = vector.multi_reduction <add>, %140, %cst_78 [1] : vector<16x32xf32> to vector<16xf32>
    %142 = vector.shape_cast %141 : vector<16xf32> to vector<16x1xf32>
    %cst_79 = arith.constant 3.200000e+01 : f32
    %143 = vector.broadcast %cst_79 : f32 to vector<16x1xf32>
    %144 = arith.divf %142, %143 : vector<16x1xf32>
    %cst_80 = arith.constant 9.99999996E-13 : f32
    %145 = vector.broadcast %cst_80 : f32 to vector<16x1xf32>
    %146 = arith.addf %144, %145 : vector<16x1xf32>
    %147 = math.rsqrt %146 : vector<16x1xf32>
    %148 = vector.broadcast %147 : vector<16x1xf32> to vector<16x32xf32>
    %149 = arith.mulf %139, %148 : vector<16x32xf32>
    %150 = vector.broadcast %131 : vector<1x32xf32> to vector<16x32xf32>
    %151 = arith.mulf %149, %150 : vector<16x32xf32>
    %152 = vector.broadcast %133 : vector<1x32xf32> to vector<16x32xf32>
    %153 = arith.addf %151, %152 : vector<16x32xf32>
    %c0_81 = arith.constant 0 : index
    %c0_82 = arith.constant 0 : index
    %c896 = arith.constant 896 : index
    %154 = vector.load %arg3[%c0_81, %c0_82, %c896] : memref<2x64x1152xf32, #tpu.memory_space<vmem>>, vector<1x32x64xf32>
    %155 = vector.shape_cast %154 : vector<1x32x64xf32> to vector<32x64xf32>
    %cst_83 = arith.constant dense<0.000000e+00> : vector<16x64xf32>
    %156 = tpu.matmul %153, %155, %cst_83 {dimension_numbers = #tpu.dot_dimension_numbers<[1], [0], [0], [1], [0, 0, 1, 1], [], []>} : vector<16x32xf32>, vector<32x64xf32>, vector<16x64xf32> -> vector<16x64xf32>
    %c0_84 = arith.constant 0 : index
    %c0_85 = arith.constant 0 : index
    %c896_86 = arith.constant 896 : index
    %157 = vector.load %arg4[%c0_84, %c0_85, %c896_86] : memref<2x1x1664xf32, #tpu.memory_space<vmem>>, vector<1x1x64xf32>
    %158 = vector.shape_cast %157 : vector<1x1x64xf32> to vector<1x64xf32>
    %159 = vector.broadcast %158 : vector<1x64xf32> to vector<16x64xf32>
    %160 = arith.addf %156, %159 : vector<16x64xf32>
    %cst_87 = arith.constant 5.000000e-01 : f32
    %161 = vector.broadcast %cst_87 : f32 to vector<16x64xf32>
    %162 = arith.mulf %161, %160 : vector<16x64xf32>
    %cst_88 = arith.constant 4.471500e-02 : f32
    %163 = vector.broadcast %cst_88 : f32 to vector<16x64xf32>
    %164 = arith.mulf %163, %160 : vector<16x64xf32>
    %165 = arith.mulf %164, %160 : vector<16x64xf32>
    %166 = arith.mulf %165, %160 : vector<16x64xf32>
    %167 = arith.addf %160, %166 : vector<16x64xf32>
    %cst_89 = arith.constant 0.797884583 : f32
    %168 = vector.broadcast %cst_89 : f32 to vector<16x64xf32>
    %169 = arith.mulf %168, %167 : vector<16x64xf32>
    %170 = math.tanh %169 : vector<16x64xf32>
    %cst_90 = arith.constant 1.000000e+00 : f32
    %171 = vector.broadcast %cst_90 : f32 to vector<16x64xf32>
    %172 = arith.addf %171, %170 : vector<16x64xf32>
    %173 = arith.mulf %162, %172 : vector<16x64xf32>
    %c0_91 = arith.constant 0 : index
    %c0_92 = arith.constant 0 : index
    %c1024 = arith.constant 1024 : index
    %174 = vector.load %arg3[%c0_91, %c0_92, %c1024] : memref<2x64x1152xf32, #tpu.memory_space<vmem>>, vector<1x64x32xf32>
    %175 = vector.shape_cast %174 : vector<1x64x32xf32> to vector<64x32xf32>
    %cst_93 = arith.constant dense<0.000000e+00> : vector<16x32xf32>
    %176 = tpu.matmul %173, %175, %cst_93 {dimension_numbers = #tpu.dot_dimension_numbers<[1], [0], [0], [1], [0, 0, 1, 1], [], []>} : vector<16x64xf32>, vector<64x32xf32>, vector<16x32xf32> -> vector<16x32xf32>
    %c0_94 = arith.constant 0 : index
    %c0_95 = arith.constant 0 : index
    %c1024_96 = arith.constant 1024 : index
    %177 = vector.load %arg4[%c0_94, %c0_95, %c1024_96] : memref<2x1x1664xf32, #tpu.memory_space<vmem>>, vector<1x1x32xf32>
    %178 = vector.shape_cast %177 : vector<1x1x32xf32> to vector<1x32xf32>
    %179 = vector.broadcast %178 : vector<1x32xf32> to vector<16x32xf32>
    %180 = arith.addf %176, %179 : vector<16x32xf32>
    %181 = arith.addf %180, %153 : vector<16x32xf32>
    %c0_97 = arith.constant 0 : index
    %c0_98 = arith.constant 0 : index
    %c1408 = arith.constant 1408 : index
    %182 = vector.load %arg4[%c0_97, %c0_98, %c1408] : memref<2x1x1664xf32, #tpu.memory_space<vmem>>, vector<1x1x32xf32>
    %183 = vector.shape_cast %182 : vector<1x1x32xf32> to vector<1x32xf32>
    %c0_99 = arith.constant 0 : index
    %c0_100 = arith.constant 0 : index
    %c1536 = arith.constant 1536 : index
    %184 = vector.load %arg4[%c0_99, %c0_100, %c1536] : memref<2x1x1664xf32, #tpu.memory_space<vmem>>, vector<1x1x32xf32>
    %185 = vector.shape_cast %184 : vector<1x1x32xf32> to vector<1x32xf32>
    %cst_101 = arith.constant dense<0.000000e+00> : vector<16xf32>
    %186 = vector.multi_reduction <add>, %181, %cst_101 [1] : vector<16x32xf32> to vector<16xf32>
    %187 = vector.shape_cast %186 : vector<16xf32> to vector<16x1xf32>
    %cst_102 = arith.constant 3.200000e+01 : f32
    %188 = vector.broadcast %cst_102 : f32 to vector<16x1xf32>
    %189 = arith.divf %187, %188 : vector<16x1xf32>
    %190 = vector.broadcast %189 : vector<16x1xf32> to vector<16x32xf32>
    %191 = arith.subf %181, %190 : vector<16x32xf32>
    %192 = arith.mulf %191, %191 : vector<16x32xf32>
    %cst_103 = arith.constant dense<0.000000e+00> : vector<16xf32>
    %193 = vector.multi_reduction <add>, %192, %cst_103 [1] : vector<16x32xf32> to vector<16xf32>
    %194 = vector.shape_cast %193 : vector<16xf32> to vector<16x1xf32>
    %cst_104 = arith.constant 3.200000e+01 : f32
    %195 = vector.broadcast %cst_104 : f32 to vector<16x1xf32>
    %196 = arith.divf %194, %195 : vector<16x1xf32>
    %cst_105 = arith.constant 9.99999996E-13 : f32
    %197 = vector.broadcast %cst_105 : f32 to vector<16x1xf32>
    %198 = arith.addf %196, %197 : vector<16x1xf32>
    %199 = math.rsqrt %198 : vector<16x1xf32>
    %200 = vector.broadcast %199 : vector<16x1xf32> to vector<16x32xf32>
    %201 = arith.mulf %191, %200 : vector<16x32xf32>
    %202 = vector.broadcast %183 : vector<1x32xf32> to vector<16x32xf32>
    %203 = arith.mulf %201, %202 : vector<16x32xf32>
    %204 = vector.broadcast %185 : vector<1x32xf32> to vector<16x32xf32>
    %205 = arith.addf %203, %204 : vector<16x32xf32>
    %c1 = arith.constant 1 : index
    %c0_106 = arith.constant 0 : index
    %c768_107 = arith.constant 768 : index
    %206 = vector.load %arg4[%c1, %c0_106, %c768_107] : memref<2x1x1664xf32, #tpu.memory_space<vmem>>, vector<1x1x32xf32>
    %207 = vector.shape_cast %206 : vector<1x1x32xf32> to vector<1x32xf32>
    %c1_108 = arith.constant 1 : index
    %c0_109 = arith.constant 0 : index
    %c0_110 = arith.constant 0 : index
    %208 = vector.load %arg3[%c1_108, %c0_109, %c0_110] : memref<2x64x1152xf32, #tpu.memory_space<vmem>>, vector<1x32x16xf32>
    %209 = vector.shape_cast %208 : vector<1x32x16xf32> to vector<32x16xf32>
    %cst_111 = arith.constant dense<0.000000e+00> : vector<16x16xf32>
    %210 = tpu.matmul %205, %209, %cst_111 {dimension_numbers = #tpu.dot_dimension_numbers<[1], [0], [0], [1], [0, 0, 1, 1], [], []>} : vector<16x32xf32>, vector<32x16xf32>, vector<16x16xf32> -> vector<16x16xf32>
    %c1_112 = arith.constant 1 : index
    %c0_113 = arith.constant 0 : index
    %c0_114 = arith.constant 0 : index
    %211 = vector.load %arg4[%c1_112, %c0_113, %c0_114] : memref<2x1x1664xf32, #tpu.memory_space<vmem>>, vector<1x1x16xf32>
    %212 = vector.shape_cast %211 : vector<1x1x16xf32> to vector<1x16xf32>
    %213 = vector.broadcast %212 : vector<1x16xf32> to vector<16x16xf32>
    %214 = arith.addf %210, %213 : vector<16x16xf32>
    %c1_115 = arith.constant 1 : index
    %c0_116 = arith.constant 0 : index
    %c256_117 = arith.constant 256 : index
    %215 = vector.load %arg3[%c1_115, %c0_116, %c256_117] : memref<2x64x1152xf32, #tpu.memory_space<vmem>>, vector<1x32x16xf32>
    %216 = vector.shape_cast %215 : vector<1x32x16xf32> to vector<32x16xf32>
    %cst_118 = arith.constant dense<0.000000e+00> : vector<16x16xf32>
    %217 = tpu.matmul %205, %216, %cst_118 {dimension_numbers = #tpu.dot_dimension_numbers<[1], [0], [0], [1], [0, 0, 1, 1], [], []>} : vector<16x32xf32>, vector<32x16xf32>, vector<16x16xf32> -> vector<16x16xf32>
    %c1_119 = arith.constant 1 : index
    %c0_120 = arith.constant 0 : index
    %c256_121 = arith.constant 256 : index
    %218 = vector.load %arg4[%c1_119, %c0_120, %c256_121] : memref<2x1x1664xf32, #tpu.memory_space<vmem>>, vector<1x1x16xf32>
    %219 = vector.shape_cast %218 : vector<1x1x16xf32> to vector<1x16xf32>
    %220 = vector.broadcast %219 : vector<1x16xf32> to vector<16x16xf32>
    %221 = arith.addf %217, %220 : vector<16x16xf32>
    %c1_122 = arith.constant 1 : index
    %c0_123 = arith.constant 0 : index
    %c512_124 = arith.constant 512 : index
    %222 = vector.load %arg3[%c1_122, %c0_123, %c512_124] : memref<2x64x1152xf32, #tpu.memory_space<vmem>>, vector<1x32x16xf32>
    %223 = vector.shape_cast %222 : vector<1x32x16xf32> to vector<32x16xf32>
    %cst_125 = arith.constant dense<0.000000e+00> : vector<16x16xf32>
    %224 = tpu.matmul %205, %223, %cst_125 {dimension_numbers = #tpu.dot_dimension_numbers<[1], [0], [0], [1], [0, 0, 1, 1], [], []>} : vector<16x32xf32>, vector<32x16xf32>, vector<16x16xf32> -> vector<16x16xf32>
    %c1_126 = arith.constant 1 : index
    %c0_127 = arith.constant 0 : index
    %c512_128 = arith.constant 512 : index
    %225 = vector.load %arg4[%c1_126, %c0_127, %c512_128] : memref<2x1x1664xf32, #tpu.memory_space<vmem>>, vector<1x1x16xf32>
    %226 = vector.shape_cast %225 : vector<1x1x16xf32> to vector<1x16xf32>
    %227 = vector.broadcast %226 : vector<1x16xf32> to vector<16x16xf32>
    %228 = arith.addf %224, %227 : vector<16x16xf32>
    %229 = vector.shape_cast %214 : vector<16x16xf32> to vector<2x8x16xf32>
    %230 = vector.shape_cast %221 : vector<16x16xf32> to vector<2x8x16xf32>
    %231 = vector.shape_cast %228 : vector<16x16xf32> to vector<2x8x16xf32>
    "tpu.trace_start"() <{level = 10 : i32, message = "bqd,bkd->bqk"}> : () -> ()
    %cst_129 = arith.constant dense<0.000000e+00> : vector<2x8x8xf32>
    %232 = tpu.matmul %229, %230, %cst_129 {dimension_numbers = #tpu.dot_dimension_numbers<[2], [2], [1], [1], [0, 0, 0, 1, 1, 1], [0], [0]>} : vector<2x8x16xf32>, vector<2x8x16xf32>, vector<2x8x8xf32> -> vector<2x8x8xf32>
    "tpu.trace_stop"() : () -> ()
    %233 = vector.broadcast %41 : vector<2x1x8xf32> to vector<2x8x8xf32>
    %234 = arith.addf %232, %233 : vector<2x8x8xf32>
    %cst_130 = arith.constant dense<0xFF800000> : vector<2x8xf32>
    %235 = vector.multi_reduction <maximumf>, %234, %cst_130 [2] : vector<2x8x8xf32> to vector<2x8xf32>
    %236 = vector.shape_cast %235 : vector<2x8xf32> to vector<2x8x1xf32>
    %237 = vector.broadcast %236 : vector<2x8x1xf32> to vector<2x8x8xf32>
    %238 = arith.subf %234, %237 : vector<2x8x8xf32>
    %239 = math.exp %238 : vector<2x8x8xf32>
    %cst_131 = arith.constant dense<0.000000e+00> : vector<2x8xf32>
    %240 = vector.multi_reduction <add>, %239, %cst_131 [2] : vector<2x8x8xf32> to vector<2x8xf32>
    %241 = vector.shape_cast %240 : vector<2x8xf32> to vector<2x8x1xf32>
    %242 = vector.broadcast %241 : vector<2x8x1xf32> to vector<2x8x8xf32>
    %243 = arith.divf %239, %242 : vector<2x8x8xf32>
    "tpu.trace_start"() <{level = 10 : i32, message = "bqk,bkd->bqd"}> : () -> ()
    %cst_132 = arith.constant dense<0.000000e+00> : vector<2x8x16xf32>
    %244 = tpu.matmul %243, %231, %cst_132 {dimension_numbers = #tpu.dot_dimension_numbers<[2], [1], [1], [2], [0, 0, 0, 1, 1, 2], [0], [0]>} : vector<2x8x8xf32>, vector<2x8x16xf32>, vector<2x8x16xf32> -> vector<2x8x16xf32>
    "tpu.trace_stop"() : () -> ()
    %245 = vector.shape_cast %244 : vector<2x8x16xf32> to vector<16x16xf32>
    %c1_133 = arith.constant 1 : index
    %c0_134 = arith.constant 0 : index
    %c768_135 = arith.constant 768 : index
    %246 = vector.load %arg3[%c1_133, %c0_134, %c768_135] : memref<2x64x1152xf32, #tpu.memory_space<vmem>>, vector<1x16x32xf32>
    %247 = vector.shape_cast %246 : vector<1x16x32xf32> to vector<16x32xf32>
    %cst_136 = arith.constant dense<0.000000e+00> : vector<16x32xf32>
    %248 = tpu.matmul %245, %247, %cst_136 {dimension_numbers = #tpu.dot_dimension_numbers<[1], [0], [0], [1], [0, 0, 1, 1], [], []>} : vector<16x16xf32>, vector<16x32xf32>, vector<16x32xf32> -> vector<16x32xf32>
    %249 = vector.broadcast %207 : vector<1x32xf32> to vector<16x32xf32>
    %250 = arith.addf %249, %248 : vector<16x32xf32>
    %c1_137 = arith.constant 1 : index
    %c0_138 = arith.constant 0 : index
    %c128_139 = arith.constant 128 : index
    %251 = vector.load %arg3[%c1_137, %c0_138, %c128_139] : memref<2x64x1152xf32, #tpu.memory_space<vmem>>, vector<1x32x16xf32>
    %252 = vector.shape_cast %251 : vector<1x32x16xf32> to vector<32x16xf32>
    %cst_140 = arith.constant dense<0.000000e+00> : vector<16x16xf32>
    %253 = tpu.matmul %205, %252, %cst_140 {dimension_numbers = #tpu.dot_dimension_numbers<[1], [0], [0], [1], [0, 0, 1, 1], [], []>} : vector<16x32xf32>, vector<32x16xf32>, vector<16x16xf32> -> vector<16x16xf32>
    %c1_141 = arith.constant 1 : index
    %c0_142 = arith.constant 0 : index
    %c128_143 = arith.constant 128 : index
    %254 = vector.load %arg4[%c1_141, %c0_142, %c128_143] : memref<2x1x1664xf32, #tpu.memory_space<vmem>>, vector<1x1x16xf32>
    %255 = vector.shape_cast %254 : vector<1x1x16xf32> to vector<1x16xf32>
    %256 = vector.broadcast %255 : vector<1x16xf32> to vector<16x16xf32>
    %257 = arith.addf %253, %256 : vector<16x16xf32>
    %c1_144 = arith.constant 1 : index
    %c0_145 = arith.constant 0 : index
    %c384_146 = arith.constant 384 : index
    %258 = vector.load %arg3[%c1_144, %c0_145, %c384_146] : memref<2x64x1152xf32, #tpu.memory_space<vmem>>, vector<1x32x16xf32>
    %259 = vector.shape_cast %258 : vector<1x32x16xf32> to vector<32x16xf32>
    %cst_147 = arith.constant dense<0.000000e+00> : vector<16x16xf32>
    %260 = tpu.matmul %205, %259, %cst_147 {dimension_numbers = #tpu.dot_dimension_numbers<[1], [0], [0], [1], [0, 0, 1, 1], [], []>} : vector<16x32xf32>, vector<32x16xf32>, vector<16x16xf32> -> vector<16x16xf32>
    %c1_148 = arith.constant 1 : index
    %c0_149 = arith.constant 0 : index
    %c384_150 = arith.constant 384 : index
    %261 = vector.load %arg4[%c1_148, %c0_149, %c384_150] : memref<2x1x1664xf32, #tpu.memory_space<vmem>>, vector<1x1x16xf32>
    %262 = vector.shape_cast %261 : vector<1x1x16xf32> to vector<1x16xf32>
    %263 = vector.broadcast %262 : vector<1x16xf32> to vector<16x16xf32>
    %264 = arith.addf %260, %263 : vector<16x16xf32>
    %c1_151 = arith.constant 1 : index
    %c0_152 = arith.constant 0 : index
    %c640_153 = arith.constant 640 : index
    %265 = vector.load %arg3[%c1_151, %c0_152, %c640_153] : memref<2x64x1152xf32, #tpu.memory_space<vmem>>, vector<1x32x16xf32>
    %266 = vector.shape_cast %265 : vector<1x32x16xf32> to vector<32x16xf32>
    %cst_154 = arith.constant dense<0.000000e+00> : vector<16x16xf32>
    %267 = tpu.matmul %205, %266, %cst_154 {dimension_numbers = #tpu.dot_dimension_numbers<[1], [0], [0], [1], [0, 0, 1, 1], [], []>} : vector<16x32xf32>, vector<32x16xf32>, vector<16x16xf32> -> vector<16x16xf32>
    %c1_155 = arith.constant 1 : index
    %c0_156 = arith.constant 0 : index
    %c640_157 = arith.constant 640 : index
    %268 = vector.load %arg4[%c1_155, %c0_156, %c640_157] : memref<2x1x1664xf32, #tpu.memory_space<vmem>>, vector<1x1x16xf32>
    %269 = vector.shape_cast %268 : vector<1x1x16xf32> to vector<1x16xf32>
    %270 = vector.broadcast %269 : vector<1x16xf32> to vector<16x16xf32>
    %271 = arith.addf %267, %270 : vector<16x16xf32>
    %272 = vector.shape_cast %257 : vector<16x16xf32> to vector<2x8x16xf32>
    %273 = vector.shape_cast %264 : vector<16x16xf32> to vector<2x8x16xf32>
    %274 = vector.shape_cast %271 : vector<16x16xf32> to vector<2x8x16xf32>
    "tpu.trace_start"() <{level = 10 : i32, message = "bqd,bkd->bqk"}> : () -> ()
    %cst_158 = arith.constant dense<0.000000e+00> : vector<2x8x8xf32>
    %275 = tpu.matmul %272, %273, %cst_158 {dimension_numbers = #tpu.dot_dimension_numbers<[2], [2], [1], [1], [0, 0, 0, 1, 1, 1], [0], [0]>} : vector<2x8x16xf32>, vector<2x8x16xf32>, vector<2x8x8xf32> -> vector<2x8x8xf32>
    "tpu.trace_stop"() : () -> ()
    %276 = vector.broadcast %41 : vector<2x1x8xf32> to vector<2x8x8xf32>
    %277 = arith.addf %275, %276 : vector<2x8x8xf32>
    %cst_159 = arith.constant dense<0xFF800000> : vector<2x8xf32>
    %278 = vector.multi_reduction <maximumf>, %277, %cst_159 [2] : vector<2x8x8xf32> to vector<2x8xf32>
    %279 = vector.shape_cast %278 : vector<2x8xf32> to vector<2x8x1xf32>
    %280 = vector.broadcast %279 : vector<2x8x1xf32> to vector<2x8x8xf32>
    %281 = arith.subf %277, %280 : vector<2x8x8xf32>
    %282 = math.exp %281 : vector<2x8x8xf32>
    %cst_160 = arith.constant dense<0.000000e+00> : vector<2x8xf32>
    %283 = vector.multi_reduction <add>, %282, %cst_160 [2] : vector<2x8x8xf32> to vector<2x8xf32>
    %284 = vector.shape_cast %283 : vector<2x8xf32> to vector<2x8x1xf32>
    %285 = vector.broadcast %284 : vector<2x8x1xf32> to vector<2x8x8xf32>
    %286 = arith.divf %282, %285 : vector<2x8x8xf32>
    "tpu.trace_start"() <{level = 10 : i32, message = "bqk,bkd->bqd"}> : () -> ()
    %cst_161 = arith.constant dense<0.000000e+00> : vector<2x8x16xf32>
    %287 = tpu.matmul %286, %274, %cst_161 {dimension_numbers = #tpu.dot_dimension_numbers<[2], [1], [1], [2], [0, 0, 0, 1, 1, 2], [0], [0]>} : vector<2x8x8xf32>, vector<2x8x16xf32>, vector<2x8x16xf32> -> vector<2x8x16xf32>
    "tpu.trace_stop"() : () -> ()
    %288 = vector.shape_cast %287 : vector<2x8x16xf32> to vector<16x16xf32>
    %c1_162 = arith.constant 1 : index
    %c16_163 = arith.constant 16 : index
    %c768_164 = arith.constant 768 : index
    %289 = vector.load %arg3[%c1_162, %c16_163, %c768_164] : memref<2x64x1152xf32, #tpu.memory_space<vmem>>, vector<1x16x32xf32>
    %290 = vector.shape_cast %289 : vector<1x16x32xf32> to vector<16x32xf32>
    %cst_165 = arith.constant dense<0.000000e+00> : vector<16x32xf32>
    %291 = tpu.matmul %288, %290, %cst_165 {dimension_numbers = #tpu.dot_dimension_numbers<[1], [0], [0], [1], [0, 0, 1, 1], [], []>} : vector<16x16xf32>, vector<16x32xf32>, vector<16x32xf32> -> vector<16x32xf32>
    %292 = arith.addf %250, %291 : vector<16x32xf32>
    %293 = arith.addf %292, %205 : vector<16x32xf32>
    %c1_166 = arith.constant 1 : index
    %c0_167 = arith.constant 0 : index
    %c1152_168 = arith.constant 1152 : index
    %294 = vector.load %arg4[%c1_166, %c0_167, %c1152_168] : memref<2x1x1664xf32, #tpu.memory_space<vmem>>, vector<1x1x32xf32>
    %295 = vector.shape_cast %294 : vector<1x1x32xf32> to vector<1x32xf32>
    %c1_169 = arith.constant 1 : index
    %c0_170 = arith.constant 0 : index
    %c1280_171 = arith.constant 1280 : index
    %296 = vector.load %arg4[%c1_169, %c0_170, %c1280_171] : memref<2x1x1664xf32, #tpu.memory_space<vmem>>, vector<1x1x32xf32>
    %297 = vector.shape_cast %296 : vector<1x1x32xf32> to vector<1x32xf32>
    %cst_172 = arith.constant dense<0.000000e+00> : vector<16xf32>
    %298 = vector.multi_reduction <add>, %293, %cst_172 [1] : vector<16x32xf32> to vector<16xf32>
    %299 = vector.shape_cast %298 : vector<16xf32> to vector<16x1xf32>
    %cst_173 = arith.constant 3.200000e+01 : f32
    %300 = vector.broadcast %cst_173 : f32 to vector<16x1xf32>
    %301 = arith.divf %299, %300 : vector<16x1xf32>
    %302 = vector.broadcast %301 : vector<16x1xf32> to vector<16x32xf32>
    %303 = arith.subf %293, %302 : vector<16x32xf32>
    %304 = arith.mulf %303, %303 : vector<16x32xf32>
    %cst_174 = arith.constant dense<0.000000e+00> : vector<16xf32>
    %305 = vector.multi_reduction <add>, %304, %cst_174 [1] : vector<16x32xf32> to vector<16xf32>
    %306 = vector.shape_cast %305 : vector<16xf32> to vector<16x1xf32>
    %cst_175 = arith.constant 3.200000e+01 : f32
    %307 = vector.broadcast %cst_175 : f32 to vector<16x1xf32>
    %308 = arith.divf %306, %307 : vector<16x1xf32>
    %cst_176 = arith.constant 9.99999996E-13 : f32
    %309 = vector.broadcast %cst_176 : f32 to vector<16x1xf32>
    %310 = arith.addf %308, %309 : vector<16x1xf32>
    %311 = math.rsqrt %310 : vector<16x1xf32>
    %312 = vector.broadcast %311 : vector<16x1xf32> to vector<16x32xf32>
    %313 = arith.mulf %303, %312 : vector<16x32xf32>
    %314 = vector.broadcast %295 : vector<1x32xf32> to vector<16x32xf32>
    %315 = arith.mulf %313, %314 : vector<16x32xf32>
    %316 = vector.broadcast %297 : vector<1x32xf32> to vector<16x32xf32>
    %317 = arith.addf %315, %316 : vector<16x32xf32>
    %c1_177 = arith.constant 1 : index
    %c0_178 = arith.constant 0 : index
    %c896_179 = arith.constant 896 : index
    %318 = vector.load %arg3[%c1_177, %c0_178, %c896_179] : memref<2x64x1152xf32, #tpu.memory_space<vmem>>, vector<1x32x64xf32>
    %319 = vector.shape_cast %318 : vector<1x32x64xf32> to vector<32x64xf32>
    %cst_180 = arith.constant dense<0.000000e+00> : vector<16x64xf32>
    %320 = tpu.matmul %317, %319, %cst_180 {dimension_numbers = #tpu.dot_dimension_numbers<[1], [0], [0], [1], [0, 0, 1, 1], [], []>} : vector<16x32xf32>, vector<32x64xf32>, vector<16x64xf32> -> vector<16x64xf32>
    %c1_181 = arith.constant 1 : index
    %c0_182 = arith.constant 0 : index
    %c896_183 = arith.constant 896 : index
    %321 = vector.load %arg4[%c1_181, %c0_182, %c896_183] : memref<2x1x1664xf32, #tpu.memory_space<vmem>>, vector<1x1x64xf32>
    %322 = vector.shape_cast %321 : vector<1x1x64xf32> to vector<1x64xf32>
    %323 = vector.broadcast %322 : vector<1x64xf32> to vector<16x64xf32>
    %324 = arith.addf %320, %323 : vector<16x64xf32>
    %cst_184 = arith.constant 5.000000e-01 : f32
    %325 = vector.broadcast %cst_184 : f32 to vector<16x64xf32>
    %326 = arith.mulf %325, %324 : vector<16x64xf32>
    %cst_185 = arith.constant 4.471500e-02 : f32
    %327 = vector.broadcast %cst_185 : f32 to vector<16x64xf32>
    %328 = arith.mulf %327, %324 : vector<16x64xf32>
    %329 = arith.mulf %328, %324 : vector<16x64xf32>
    %330 = arith.mulf %329, %324 : vector<16x64xf32>
    %331 = arith.addf %324, %330 : vector<16x64xf32>
    %cst_186 = arith.constant 0.797884583 : f32
    %332 = vector.broadcast %cst_186 : f32 to vector<16x64xf32>
    %333 = arith.mulf %332, %331 : vector<16x64xf32>
    %334 = math.tanh %333 : vector<16x64xf32>
    %cst_187 = arith.constant 1.000000e+00 : f32
    %335 = vector.broadcast %cst_187 : f32 to vector<16x64xf32>
    %336 = arith.addf %335, %334 : vector<16x64xf32>
    %337 = arith.mulf %326, %336 : vector<16x64xf32>
    %c1_188 = arith.constant 1 : index
    %c0_189 = arith.constant 0 : index
    %c1024_190 = arith.constant 1024 : index
    %338 = vector.load %arg3[%c1_188, %c0_189, %c1024_190] : memref<2x64x1152xf32, #tpu.memory_space<vmem>>, vector<1x64x32xf32>
    %339 = vector.shape_cast %338 : vector<1x64x32xf32> to vector<64x32xf32>
    %cst_191 = arith.constant dense<0.000000e+00> : vector<16x32xf32>
    %340 = tpu.matmul %337, %339, %cst_191 {dimension_numbers = #tpu.dot_dimension_numbers<[1], [0], [0], [1], [0, 0, 1, 1], [], []>} : vector<16x64xf32>, vector<64x32xf32>, vector<16x32xf32> -> vector<16x32xf32>
    %c1_192 = arith.constant 1 : index
    %c0_193 = arith.constant 0 : index
    %c1024_194 = arith.constant 1024 : index
    %341 = vector.load %arg4[%c1_192, %c0_193, %c1024_194] : memref<2x1x1664xf32, #tpu.memory_space<vmem>>, vector<1x1x32xf32>
    %342 = vector.shape_cast %341 : vector<1x1x32xf32> to vector<1x32xf32>
    %343 = vector.broadcast %342 : vector<1x32xf32> to vector<16x32xf32>
    %344 = arith.addf %340, %343 : vector<16x32xf32>
    %345 = arith.addf %344, %317 : vector<16x32xf32>
    %c1_195 = arith.constant 1 : index
    %c0_196 = arith.constant 0 : index
    %c1408_197 = arith.constant 1408 : index
    %346 = vector.load %arg4[%c1_195, %c0_196, %c1408_197] : memref<2x1x1664xf32, #tpu.memory_space<vmem>>, vector<1x1x32xf32>
    %347 = vector.shape_cast %346 : vector<1x1x32xf32> to vector<1x32xf32>
    %c1_198 = arith.constant 1 : index
    %c0_199 = arith.constant 0 : index
    %c1536_200 = arith.constant 1536 : index
    %348 = vector.load %arg4[%c1_198, %c0_199, %c1536_200] : memref<2x1x1664xf32, #tpu.memory_space<vmem>>, vector<1x1x32xf32>
    %349 = vector.shape_cast %348 : vector<1x1x32xf32> to vector<1x32xf32>
    %cst_201 = arith.constant dense<0.000000e+00> : vector<16xf32>
    %350 = vector.multi_reduction <add>, %345, %cst_201 [1] : vector<16x32xf32> to vector<16xf32>
    %351 = vector.shape_cast %350 : vector<16xf32> to vector<16x1xf32>
    %cst_202 = arith.constant 3.200000e+01 : f32
    %352 = vector.broadcast %cst_202 : f32 to vector<16x1xf32>
    %353 = arith.divf %351, %352 : vector<16x1xf32>
    %354 = vector.broadcast %353 : vector<16x1xf32> to vector<16x32xf32>
    %355 = arith.subf %345, %354 : vector<16x32xf32>
    %356 = arith.mulf %355, %355 : vector<16x32xf32>
    %cst_203 = arith.constant dense<0.000000e+00> : vector<16xf32>
    %357 = vector.multi_reduction <add>, %356, %cst_203 [1] : vector<16x32xf32> to vector<16xf32>
    %358 = vector.shape_cast %357 : vector<16xf32> to vector<16x1xf32>
    %cst_204 = arith.constant 3.200000e+01 : f32
    %359 = vector.broadcast %cst_204 : f32 to vector<16x1xf32>
    %360 = arith.divf %358, %359 : vector<16x1xf32>
    %cst_205 = arith.constant 9.99999996E-13 : f32
    %361 = vector.broadcast %cst_205 : f32 to vector<16x1xf32>
    %362 = arith.addf %360, %361 : vector<16x1xf32>
    %363 = math.rsqrt %362 : vector<16x1xf32>
    %364 = vector.broadcast %363 : vector<16x1xf32> to vector<16x32xf32>
    %365 = arith.mulf %355, %364 : vector<16x32xf32>
    %366 = vector.broadcast %347 : vector<1x32xf32> to vector<16x32xf32>
    %367 = arith.mulf %365, %366 : vector<16x32xf32>
    %368 = vector.broadcast %349 : vector<1x32xf32> to vector<16x32xf32>
    %369 = arith.addf %367, %368 : vector<16x32xf32>
    %c0_206 = arith.constant 0 : index
    %c0_207 = arith.constant 0 : index
    %370 = vector.load %arg5[%c0_206, %c0_207] : memref<40x256xf32, #tpu.memory_space<vmem>>, vector<32x32xf32>
    %cst_208 = arith.constant dense<0.000000e+00> : vector<16x32xf32>
    %371 = tpu.matmul %369, %370, %cst_208 {dimension_numbers = #tpu.dot_dimension_numbers<[1], [0], [0], [1], [0, 0, 1, 1], [], []>} : vector<16x32xf32>, vector<32x32xf32>, vector<16x32xf32> -> vector<16x32xf32>
    %c32 = arith.constant 32 : index
    %c0_209 = arith.constant 0 : index
    %372 = vector.load %arg5[%c32, %c0_209] : memref<40x256xf32, #tpu.memory_space<vmem>>, vector<1x32xf32>
    %373 = vector.broadcast %372 : vector<1x32xf32> to vector<16x32xf32>
    %374 = arith.addf %371, %373 : vector<16x32xf32>
    %375 = math.tanh %374 : vector<16x32xf32>
    %c0_210 = arith.constant 0 : index
    %c128_211 = arith.constant 128 : index
    %376 = vector.load %arg5[%c0_210, %c128_211] : memref<40x256xf32, #tpu.memory_space<vmem>>, vector<32x128xf32>
    %cst_212 = arith.constant dense<0.000000e+00> : vector<16x128xf32>
    %377 = tpu.matmul %375, %376, %cst_212 {dimension_numbers = #tpu.dot_dimension_numbers<[1], [0], [0], [1], [0, 0, 1, 1], [], []>} : vector<16x32xf32>, vector<32x128xf32>, vector<16x128xf32> -> vector<16x128xf32>
    %c32_213 = arith.constant 32 : index
    %c128_214 = arith.constant 128 : index
    %378 = vector.load %arg5[%c32_213, %c128_214] : memref<40x256xf32, #tpu.memory_space<vmem>>, vector<1x128xf32>
    %379 = vector.broadcast %378 : vector<1x128xf32> to vector<16x128xf32>
    %380 = arith.addf %377, %379 : vector<16x128xf32>
    %c0_215 = arith.constant 0 : index
    %c0_216 = arith.constant 0 : index
    %381 = vector.load %arg6[%c0_215, %c0_216] : memref<16x128xf32, #tpu.memory_space<vmem>>, vector<16x128xf32>
    tpu.vector_store %arg6[%c0_215, %c0_216], %380 {strides = array<i32>} : memref<16x128xf32, #tpu.memory_space<vmem>>, vector<16x128xf32>,
    return
  }
}

</mosaic_0001>

<bundles_post_ra>
// kernel: bert_classifier_forward.1
= control target key start
LH: loop header
LB: loop body
LE: loop exit
PB: predicated region body
PF: predicated region fallthrough
CT: control target
= control target key end

     0   :  { %11 = vsyncpa [#allocation3], 0  ;;  %s4420_s21 = smov [#allocation2]   ;;  %s4861_s0 = inlined_call_operand.vmem [shape: s32[16,1], index: 0, kind: input, shape index: {}]   ;;  %s4862_s1 = inlined_call_operand.vmem [shape: s32[2,1,8], index: 1, kind: input, shape index: {}]   ;;  %s4863_s2 = inlined_call_operand.vmem [shape: f32[144,32], index: 2, kind: input, shape index: {}]   ;;  %s4864_s3 = inlined_call_operand.hbm [shape: f32[2,64,1152], index: 3, kind: input, shape index: {}]   ;;  %s4865_s4 = inlined_call_operand.vmem [shape: f32[2,1,1664], index: 4, kind: input, shape index: {}]   ;;  %s4866_s5 = inlined_call_operand.vmem [shape: f32[40,256], index: 5, kind: input, shape index: {}]   ;;  %s4867_s6 = inlined_call_operand.vmem [shape: f32[16,128], index: 6, kind: output, shape index: {}]  }
   0x1   :  { %s23_s22 = sshll.u32 %s4420_s21, 4  ;;  %s24_s22 = int_to_ptr.vmem [resolvable:$true] %s23_s22 }
   0x2   :  { %s4406_s23 = scalar_lea.vmem %s24_s22, 18432  ;;  %p4411_p1 = scmp.lt.s32.totalorder %s24_s22, %s24_s22 }
   0x3   :  { %p4407_p0 = scmp.ne.s32.totalorder %s24_s22, %s4406_s23  ;;  %p4412_p2 = scmp.lt.s32.totalorder %s4406_s23, %s4406_s23 }
   0x5   :  { %p4413_p3 = por %p4412_p2, %p4411_p1 }
   0x7   :  { %p4414_p4 = pnand %p4413_p3, %p4407_p0 }
   0x9   :  { %4417 = shalt.err (!%p4414_p4)
}
   0xa   :  { %s4421_s24 = smov 1152   ;;  %s4422_s25 = smov 72  }
   0xb   :  { %29 = dma.hbm_to_vmem [thread:$0]  %s4864_s3, 18432, %s24_s22, [#allocation3], %s4421_s24, %s4421_s24, %s4422_s25  }
   0xc   :  { %4418 = dma.done.wait [#allocation3], 18432  }
   0xd   :  { %4419 = vsyncadd [#allocation3], 4294948864  ;;  %v4423_v0 = vmov 0   ;;  %vm75_vm0 = vcmask 1043456   ;;  %v37_v1 = vld [vmem:[%s4861_s0] sm:$0xff]  ;;  %v64_v3 = vld [vmem:[%s4863_s2 + $0x58] sm:$0xff]  ;;  %v39_v17 = vlaneseq }
   0xe   :  { %4333 = vset.pattern.permute.xlu0 %v4423_v0  ;;  %v65_v2 = vld [vmem:[%s4863_s2 + $0x60] sm:$0xf]  ;;  %v38_v4 = vld [vmem:[%s4861_s0 + $0x8] sm:$0xff]  ;;  %v63_v5 = vld [vmem:[%s4863_s2 + $0x50] sm:$0xff]  ;;  %v4424_v16 = vmov 0.0   ;;  %vm68_vm1 = vcmask 818176  }
   0xf   :  { %42 = vperm.xlu0 %4333, %v37_v1   ;;  %3976 = vmatprep.subr.msk.mxu0 %vm75_vm0, %v65_v2  ;;  %v62_v6 = vld [vmem:[%s4863_s2 + $0x48] sm:$0xff]  ;;  %v61_v7 = vld [vmem:[%s4863_s2 + $0x40] sm:$0xff]  ;;  %v60_v8 = vld [vmem:[%s4863_s2 + $0x38] sm:$0xff]  ;;  %v40_v18 = vand.u32 127, %v39_v17  ;;  %vm162_vm4 = vcmask 261120   ;;  %vm4425_vm5 = vmmov 0  }
  0x10   :  { %3977 = vmatpush3.msk.msra.mxu0 %vm75_vm0, %v65_v2  ;;  %v59_v9 = vld [vmem:[%s4863_s2 + $0x30] sm:$0xff]  ;;  %v58_v10 = vld [vmem:[%s4863_s2 + $0x28] sm:$0xff]  ;;  %v57_v11 = vld [vmem:[%s4863_s2 + $0x20] sm:$0xff]  ;;  %vm487_vm6 = vcmask 130048   ;;  %vm640_vm7 = vcmask 64512   ;;  %vm1734_vm8 = vcmask 523264  }
  0x11   :  { %3978 = vmatprep.subr.mxu0 %v64_v3  ;;  %v56_v12 = vld [vmem:[%s4863_s2 + $0x18] sm:$0xff]  ;;  %v55_v13 = vld [vmem:[%s4863_s2 + $0x10] sm:$0xff]  ;;  %v54_v14 = vld [vmem:[%s4863_s2 + $0x8] sm:$0xff] }
  0x12   :  { %3979 = vmatpush3.msra.mxu0 %v64_v3  ;;  %v53_v15 = vld [vmem:[%s4863_s2] sm:$0xff]  ;;  %v66_v24 = vld [vmem:[%s4863_s2 + $0x68] sm:$0xff]  ;;  %v3687_v28 = vld [vmem:[%s4863_s2 + $0x78] ss:$0 sm:$0xff] }
  0x13   :  { %45 = vperm.xlu0 %4333, %v38_v4   ;;  %3980 = vmatprep.subr.mxu0 %v63_v5  ;;  %v214_v43 = vld [vmem:[#allocation2 + $0xd8] sm:$0xff]  ;;  %v213_v44 = vld [vmem:[#allocation2 + $0x90] sm:$0xff]  ;;  %v212_v45 = vld [vmem:[#allocation2 + $0x48] sm:$0xff] }
  0x14   :  { %3981 = vmatpush3.msra.mxu0 %v63_v5  ;;  %4005 = vmatprep.subr.mxu1 %v214_v43  ;;  %v211_v46 = vld [vmem:[#allocation2] sm:$0xff]  ;;  %v306_v47 = vld [vmem:[#allocation2 + $0xe8] sm:$0xff]  ;;  %v304_v1 = vld [vmem:[#allocation2 + $0x58] sm:$0xff] }
  0x15   :  { %3982 = vmatprep.subr.mxu0 %v62_v6  ;;  %4006 = vmatpush3.msra.mxu1 %v214_v43  ;;  %v3688_v55 = vld [vmem:[%s4863_s2 + $0x80] ss:$0 sm:$0xff]  ;;  %v3689_v57 = vld [vmem:[%s4863_s2 + $0x88] ss:$0 sm:$0xff]  ;;  %v303_v2 = vld [vmem:[#allocation2 + $0x10] sm:$0xff] }
  0x16   :  { %3983 = vmatpush3.msra.mxu0 %v62_v6  ;;  %4007 = vmatprep.subr.mxu1 %v213_v44  ;;  %v305_v0 = vld [vmem:[#allocation2 + $0xa0] sm:$0xff]  ;;  %v392_v3 = vld [vmem:[#allocation2 + $0xf8] sm:$0xff]  ;;  %v391_v4 = vld [vmem:[#allocation2 + $0xb0] sm:$0xff] }
  0x17   :  { %3984 = vmatprep.subr.mxu0 %v61_v7  ;;  %4008 = vmatpush3.msra.mxu1 %v213_v44  ;;  %v390_v5 = vld [vmem:[#allocation2 + $0x68] sm:$0xff]  ;;  %v389_v6 = vld [vmem:[#allocation2 + $0x20] sm:$0xff] }
  0x18   :  { %3985 = vmatpush3.msra.mxu0 %v61_v7  ;;  %4009 = vmatprep.subr.mxu1 %v212_v45 }
  0x19   :  { %3986 = vmatprep.subr.mxu0 %v60_v8  ;;  %4010 = vmatpush3.msra.mxu1 %v212_v45 }
  0x1a   :  { %3987 = vmatpush3.msra.mxu0 %v60_v8  ;;  %4011 = vmatprep.subr.mxu1 %v211_v46 }
  0x1b   :  { %3988 = vmatprep.subr.mxu0 %v59_v9  ;;  %4012 = vmatpush3.msra.mxu1 %v211_v46 }
  0x1c   :  { %3989 = vmatpush3.msra.mxu0 %v59_v9  ;;  %4016 = vmatprep.subr.mxu1 %v306_v47 }
  0x1d   :  { %3990 = vmatprep.subr.mxu0 %v58_v10 }
  0x1e   :  { %3991 = vmatpush3.msra.mxu0 %v58_v10  ;;  %v3693_v10 = vld [vmem:[%s4865_s4 + $0x2] ss:$0 sm:$0xff] }
  0x1f   :  { %3992 = vmatprep.subr.mxu0 %v57_v11 }
  0x20   :  { %3993 = vmatpush3.msra.mxu0 %v57_v11 }
  0x21   :  { %3994 = vmatprep.subr.mxu0 %v56_v12 }
  0x22   :  { %3995 = vmatpush3.msra.mxu0 %v56_v12 }
  0x23   :  { %3996 = vmatprep.subr.mxu0 %v55_v13 }
  0x24   :  { %3997 = vmatpush3.msra.mxu0 %v55_v13  ;;  %v3690_v13 = vld [vmem:[%s4865_s4] ss:$0 sm:$0xff] }
  0x25   :  { %3998 = vmatprep.subr.mxu0 %v54_v14 }
  0x26   :  { %3999 = vmatpush3.msra.mxu0 %v54_v14 }
  0x27   :  { %4000 = vmatprep.subr.mxu0 %v53_v15 }
  0x28   :  { %4001 = vmatpush3.msra.mxu0 %v53_v15 }
  0x29   :  { %4038 = vmatprep.subr.mxu0 %v4424_v16 }
  0x8a   :  { %v43_v19 = vpop.permute.xlu0 %42 }
  0x8b   :  { %vm47_vm2 = vcmp.eq.s32.totalorder %v40_v18, %v43_v19  ;;  %v3696_v19 = vld [vmem:[%s4865_s4 + $0x4] ss:$0 sm:$0xff] }
  0x8c   :  { %v3682_v20 = vsel %vm47_vm2, 1.0, %v4424_v16 }
  0x8d   :  { %4002 = vmatprep.mubr.msk.f32.mxu0 %vm68_vm1, %v3682_v20 }
  0x8e   :  { %v46_v21 = vpop.permute.xlu0 %45 }
  0x8f   :  { %vm48_vm3 = vcmp.eq.s32.totalorder %v40_v18, %v46_v21 }
  0x90   :  { %v3683_v22 = vsel %vm48_vm3, 1.0, %v4424_v16 }
  0x91   :  { %4003 = vmatmul.mubr.msk.f32.vlgmr.msra.gmra.mxu0 %vm68_vm1, %v3683_v22 }
  0x92   :  { %4040 = vmatprep.mubr.msk.f32.mxu0 %vm4425_vm5, %v4424_v16 }
 0x151   :  { %v4004_v23 = vpop.f32.mrf.mxu0 }
 0x152   :  { %v151_v26 = vadd.f32 %v4004_v23, %v66_v24 }
 0x153   :  { %v145_v25 = vpop.f32.mrf.mxu0 }
 0x154   :  { %v146_v27 = vadd.f32 %v145_v25, %v66_v24  ;;  %v159_v31 = vadd.f32 %v3687_v28, %v151_v26  ;;  %v202_v24 = vld [vmem:[%s4862_s1] sm:$0x1]  ;;  %v203_v26 = vld [vmem:[%s4862_s1 + $0x1] sm:$0x1] }
 0x155   :  { %v204_v25 = vcvt.s32.f32 %v202_v24 }
 0x156   :  { %v158_v29 = vadd.f32 %v3687_v28, %v146_v27  ;;  %v166_v32 = vsel %vm162_vm4, %v159_v31, 0.0  ;;  %v478_v27 = vshrl.u32 %v39_v17, 7 }
 0x157   :  { %v206_v28 = vsub.f32 1.0, %v204_v25 }
 0x158   :  { %v163_v30 = vsel %vm162_vm4, %v158_v29, 0.0 }
 0x159   :  { %164 = vadd.xlane.f32.xlu1 %v163_v30  ;;  %v479_v30 = vsub.s32 0, %v478_v27  ;;  %v3711_v27 = vld [vmem:[%s4865_s4 + $0x3] ss:$0 sm:$0xff] }
 0x15d   :  { %167 = vadd.xlane.f32.xlu1 %v166_v32 }
 0x1e2   :  { %v165_v33 = vpop.xlane.xlu1 %164 }
 0x1e3   :  { %v170_v34 = vmul.f32 0.03125, %v165_v33 }
 0x1e5   :  { %v172_v35 = vsub.f32 %v158_v29, %v170_v34  ;;  %v205_v29 = vcvt.s32.f32 %v203_v26 }
 0x1e6   :  { %v168_v36 = vpop.xlane.xlu1 %167 }
 0x1e7   :  { %v171_v37 = vmul.f32 0.03125, %v168_v36  ;;  %v174_v38 = vmul.f32 %v172_v35, %v172_v35  ;;  %v207_v32 = vsub.f32 1.0, %v205_v29 }
 0x1e9   :  { %v173_v39 = vsub.f32 %v159_v31, %v171_v37  ;;  %v176_v40 = vsel %vm162_vm4, %v174_v38, 0.0  ;;  %v208_v31 = vmul.f32 -1e+09, %v206_v28  ;;  %v209_v34 = vmul.f32 -1e+09, %v207_v32 }
 0x1ea   :  { %177 = vadd.xlane.f32.xlu0 %v176_v40 }
 0x1eb   :  { %v175_v41 = vmul.f32 %v173_v39, %v173_v39  ;;  %v4576_v33 = vrot.slane %v208_v31, %v479_v30  ;;  %v4579_v37 = vrot.slane %v209_v34, %v479_v30  ;;  %v3708_v30 = vld [vmem:[%s4865_s4 + $0x1] ss:$0 sm:$0xff] }
 0x1ed   :  { %v179_v42 = vsel %vm162_vm4, %v175_v41, 0.0 }
 0x1ee   :  { %180 = vadd.xlane.f32.xlu1 %v179_v42 }
 0x273   :  { %v178_v48 = vpop.xlane.xlu0 %177 }
 0x274   :  { %v182_v49 = vmul.f32 0.03125, %v178_v48 }
 0x276   :  { %v184_v50 = vadd.f32 1e-12, %v182_v49 }
 0x277   :  { %v181_v51 = vpop.xlane.xlu1 %180 }
 0x278   :  { %4334 = vrsqrt.f32 %v184_v50  ;;  %v183_v52 = vmul.f32 0.03125, %v181_v51 }
 0x27a   :  { %v185_v53 = vadd.f32 1e-12, %v183_v52 }
 0x27c   :  { %4336 = vrsqrt.f32 %v185_v53  ;;  %v903_v53 = vld [vmem:[#allocation2 + $0xe0] sm:$0xff] }
 0x285   :  { %v4335_v54 = vpop.eup %4334 }
 0x286   :  { %v188_v56 = vmul.f32 %v4335_v54, %v172_v35 }
 0x288   :  { %v194_v58 = vmul.f32 %v3688_v55, %v188_v56 }
 0x289   :  { %v4337_v59 = vpop.eup %4336 }
 0x28a   :  { %v4529_v60 = vadd.f32 %v3689_v57, %v194_v58  ;;  %v189_v61 = vmul.f32 %v4337_v59, %v173_v39 }
 0x28c   :  { %v195_v62 = vmul.f32 %v3688_v55, %v189_v61  ;;  %4013 = vmatprep.mubr.msk.f32.mxu1 %vm162_vm4, %v4529_v60  ;;  %v902_v61 = vld [vmem:[#allocation2 + $0x98] sm:$0xff] }
 0x28e   :  { %v4533_v63 = vadd.f32 %v3689_v57, %v195_v62  ;;  %v901_v62 = vld [vmem:[#allocation2 + $0x50] sm:$0xff] }
 0x290   :  { %4014 = vmatmul.mubr.msk.f32.vlgmr.msra.gmra.mxu1 %vm162_vm4, %v4533_v63 }
 0x291   :  { %4017 = vmatpush3.msra.mxu1 %v306_v47  ;;  %4024 = vmatprep.mubr.msk.f32.mxu1 %vm162_vm4, %v4529_v60 }
 0x292   :  { %4018 = vmatprep.subr.mxu1 %v305_v0 }
 0x293   :  { %4019 = vmatpush3.msra.mxu1 %v305_v0  ;;  %v900_v0 = vld [vmem:[#allocation2 + $0x8] sm:$0xff] }
 0x294   :  { %4020 = vmatprep.subr.mxu1 %v304_v1 }
 0x295   :  { %4021 = vmatpush3.msra.mxu1 %v304_v1  ;;  %v1075_v1 = vld [vmem:[#allocation2 + $0x100] sm:$0xff] }
 0x296   :  { %4022 = vmatprep.subr.mxu1 %v303_v2 }
 0x297   :  { %4023 = vmatpush3.msra.mxu1 %v303_v2  ;;  %v1074_v2 = vld [vmem:[#allocation2 + $0xb8] sm:$0xff] }
 0x298   :  { %4025 = vmatmul.mubr.msk.f32.vlgmr.msra.gmra.mxu1 %vm162_vm4, %v4533_v63  ;;  %4027 = vmatprep.subr.mxu1 %v392_v3 }
 0x299   :  { %4028 = vmatpush3.msra.mxu1 %v392_v3  ;;  %4035 = vmatprep.mubr.msk.f32.mxu1 %vm162_vm4, %v4529_v60  ;;  %v1073_v3 = vld [vmem:[#allocation2 + $0x70] sm:$0xff] }
 0x29a   :  { %4029 = vmatprep.subr.mxu1 %v391_v4 }
 0x29b   :  { %4030 = vmatpush3.msra.mxu1 %v391_v4  ;;  %v1072_v4 = vld [vmem:[#allocation2 + $0x28] sm:$0xff] }
 0x29c   :  { %4031 = vmatprep.subr.mxu1 %v390_v5 }
 0x29d   :  { %4032 = vmatpush3.msra.mxu1 %v390_v5  ;;  %v810_v5 = vld [vmem:[#allocation2 + $0x78] sm:$0xff] }
 0x29e   :  { %4033 = vmatprep.subr.mxu1 %v389_v6 }
 0x29f   :  { %4034 = vmatpush3.msra.mxu1 %v389_v6  ;;  %v809_v6 = vld [vmem:[#allocation2 + $0x30] sm:$0xff] }
 0x2a0   :  { %4036 = vmatmul.mubr.msk.f32.vlgmr.msra.gmra.mxu1 %vm162_vm4, %v4533_v63  ;;  %4048 = vmatprep.subr.mxu1 %v4424_v16 }
 0x2a1   :  { %4050 = vmatprep.mubr.msk.f32.mxu1 %vm4425_vm5, %v4424_v16 }
 0x350   :  { %v4015_v7 = vpop.f32.mrf.mxu1 }
 0x351   :  { %v300_v20 = vadd.f32 %v4015_v7, %v3690_v13  ;;  %v989_v7 = vld [vmem:[#allocation2 + $0xf0] sm:$0xff] }
 0x352   :  { %v294_v8 = vpop.f32.mrf.mxu1 }
 0x353   :  { %v295_v14 = vadd.f32 %v3690_v13, %v294_v8  ;;  %v987_v13 = vld [vmem:[#allocation2 + $0x60] sm:$0xff] }
 0x358   :  { %v4026_v9 = vpop.f32.mrf.mxu1 }
 0x359   :  { %v386_v15 = vadd.f32 %v4026_v9, %v3693_v10 }
 0x35a   :  { %v380_v11 = vpop.f32.mrf.mxu1 }
 0x35b   :  { %v381_v12 = vadd.f32 %v3693_v10, %v380_v11  ;;  %v988_v11 = vld [vmem:[#allocation2 + $0xa8] sm:$0xff] }
 0x35d   :  { %4039 = vmatpush3.xpose.msk.msra.mxu0 %vm487_vm6, %v381_v12 }
 0x35e   :  { %4043 = vmatprep.subr.mxu0 %v4424_v16 }
 0x360   :  { %v4037_v18 = vpop.f32.mrf.mxu1  ;;  %4041 = vmatmul.mubr.msk.f32.vlgmr.msra.gmra.mxu0 %vm487_vm6, %v295_v14  ;;  %v986_v14 = vld [vmem:[#allocation2 + $0x18] sm:$0xff] }
 0x361   :  { %4044 = vmatpush3.xpose.msk.msra.mxu0 %vm487_vm6, %v386_v15  ;;  %4045 = vmatprep.mubr.msk.f32.mxu0 %vm4425_vm5, %v4424_v16  ;;  %v472_v22 = vadd.f32 %v4037_v18, %v3696_v19 }
 0x362   :  { %v466_v21 = vpop.f32.mrf.mxu1  ;;  %4053 = vmatprep.subr.mxu0 %v4424_v16 }
 0x363   :  { %v467_v23 = vadd.f32 %v3696_v19, %v466_v21  ;;  %v3714_v19 = vld [vmem:[%s4865_s4 + $0x5] ss:$0 sm:$0xff] }
 0x364   :  { %4046 = vmatmul.mubr.msk.f32.vlgmr.msra.gmra.mxu0 %vm487_vm6, %v300_v20 }
 0x365   :  { %4049 = vmatpush3.msra.mxu1 %v467_v23  ;;  %4054 = vmatpush3.msra.mxu0 %v472_v22 }
 0x366   :  { %4055 = vmatprep.mubr.msk.f32.mxu0 %vm4425_vm5, %v4424_v16  ;;  %4065 = vmatprep.subr.mxu0 %v903_v53 }
 0x367   :  { %4058 = vmatprep.subr.mxu1 %v810_v5 }
 0x420   :  { %v560_v35 = vpop.f32.mrf.mxu0 }
 0x421   :  { %v561_v36 = vadd.f32 %v560_v35, %v4576_v33 }
 0x422   :  { %v4042_v38 = vpop.f32.mrf.mxu0 }
 0x423   :  { %v641_v39 = vsel %vm640_vm7, %v561_v36, -inf }
 0x424   :  { %642 = vmax.xlane.f32.xlu1 %v641_v39  ;;  %v636_v40 = vpop.f32.mrf.mxu0 }
 0x425   :  { %v637_v17 = vadd.f32 %v636_v40, %v4579_v37 }
 0x426   :  { %v4047_v41 = vpop.f32.mrf.mxu0 }
 0x427   :  { %v644_v42 = vsel %vm640_vm7, %v637_v17, -inf }
 0x428   :  { %645 = vmax.xlane.f32.xlu1 %v644_v42 }
 0x4ad   :  { %v643_v43 = vpop.xlane.xlu1 %642 }
 0x4ae   :  { %v647_v44 = vsub.f32 %v561_v36, %v643_v43 }
 0x4b0   :  { %v649_v45 = vmul.f32 1.442695, %v647_v44 }
 0x4b1   :  { %v646_v46 = vpop.xlane.xlu1 %645 }
 0x4b2   :  { %4338 = vpow2.f32 %v649_v45  ;;  %v648_v47 = vsub.f32 %v637_v17, %v646_v46 }
 0x4b4   :  { %v651_v48 = vmul.f32 1.442695, %v648_v47 }
 0x4b6   :  { %4340 = vpow2.f32 %v651_v48 }
 0x4bf   :  { %v4339_v49 = vpop.eup %4338 }
 0x4c0   :  { %v653_v50 = vsel %vm640_vm7, %v4339_v49, 0.0 }
 0x4c1   :  { %654 = vadd.xlane.f32.xlu1 %v653_v50 }
 0x4c3   :  { %v4341_v51 = vpop.eup %4340 }
 0x4c4   :  { %v656_v52 = vsel %vm640_vm7, %v4341_v51, 0.0 }
 0x4c5   :  { %657 = vadd.xlane.f32.xlu1 %v656_v52 }
 0x54a   :  { %v655_v54 = vpop.xlane.xlu1 %654 }
 0x54b   :  { %4342 = vrcp.f32 %v655_v54 }
 0x54e   :  { %v658_v55 = vpop.xlane.xlu1 %657 }
 0x54f   :  { %4344 = vrcp.f32 %v658_v55 }
 0x558   :  { %v4343_v56 = vpop.eup %4342 }
 0x559   :  { %v660_v57 = vmul.f32 %v4343_v56, %v4339_v49 }
 0x55b   :  { %4051 = vmatmul.mubr.msk.f32.vlgmr.msra.gmra.mxu1 %vm640_vm7, %v660_v57 }
 0x55c   :  { %v4345_v58 = vpop.eup %4344  ;;  %4059 = vmatpush3.msra.mxu1 %v810_v5 }
 0x55d   :  { %v662_v59 = vmul.f32 %v4345_v58, %v4341_v51  ;;  %4060 = vmatprep.subr.mxu1 %v809_v6 }
 0x55e   :  { %4061 = vmatpush3.msra.mxu1 %v809_v6 }
 0x55f   :  { %4056 = vmatmul.mubr.msk.f32.vlgmr.msra.gmra.mxu0 %vm640_vm7, %v662_v59  ;;  %4076 = vmatprep.subr.mxu1 %v989_v7  ;;  %v1479_v59 = vld [vmem:[#allocation2 + $0x108] sm:$0xff] }
 0x560   :  { %4066 = vmatpush3.msra.mxu0 %v903_v53  ;;  %4073 = vmatprep.mubr.msk.f32.mxu0 %vm162_vm4, %v4529_v60 }
 0x561   :  { %4067 = vmatprep.subr.mxu0 %v902_v61 }
 0x562   :  { %4068 = vmatpush3.msra.mxu0 %v902_v61  ;;  %v1478_v61 = vld [vmem:[#allocation2 + $0xc0] sm:$0xff] }
 0x563   :  { %4069 = vmatprep.subr.mxu0 %v901_v62 }
 0x564   :  { %4070 = vmatpush3.msra.mxu0 %v901_v62 }
 0x565   :  { %4071 = vmatprep.subr.mxu0 %v900_v0 }
 0x566   :  { %4072 = vmatpush3.msra.mxu0 %v900_v0 }
 0x567   :  { %4074 = vmatmul.mubr.msk.f32.vlgmr.msra.gmra.mxu0 %vm162_vm4, %v4533_v63  ;;  %4087 = vmatprep.subr.mxu0 %v1075_v1 }
 0x568   :  { %4088 = vmatpush3.msra.mxu0 %v1075_v1  ;;  %4095 = vmatprep.mubr.msk.f32.mxu0 %vm162_vm4, %v4529_v60 }
 0x569   :  { %4089 = vmatprep.subr.mxu0 %v1074_v2 }
 0x56a   :  { %4090 = vmatpush3.msra.mxu0 %v1074_v2 }
 0x56b   :  { %4091 = vmatprep.subr.mxu0 %v1073_v3 }
 0x56c   :  { %4092 = vmatpush3.msra.mxu0 %v1073_v3  ;;  %v3707_v3 = vld [vmem:[%s4865_s4 + $0x6] ss:$0 sm:$0xff] }
 0x56d   :  { %4093 = vmatprep.subr.mxu0 %v1072_v4 }
 0x56e   :  { %4094 = vmatpush3.msra.mxu0 %v1072_v4 }
 0x56f   :  { %4096 = vmatmul.mubr.msk.f32.vlgmr.msra.gmra.mxu0 %vm162_vm4, %v4533_v63  ;;  %4108 = vmatprep.subr.mxu0 %v4424_v16 }
 0x570   :  { %4110 = vmatprep.mubr.msk.f32.mxu0 %vm4425_vm5, %v4424_v16 }
 0x61b   :  { %v732_v8 = vpop.f32.mrf.mxu1 }
 0x61c   :  { %4062 = vmatprep.mubr.msk.f32.mxu1 %vm487_vm6, %v732_v8 }
 0x61d   :  { %v4052_v9 = vpop.f32.mrf.mxu1 }
 0x61f   :  { %v805_v10 = vpop.f32.mrf.mxu0 }
 0x620   :  { %4063 = vmatmul.mubr.msk.f32.vlgmr.msra.gmra.mxu1 %vm487_vm6, %v805_v10 }
 0x621   :  { %4077 = vmatpush3.msra.mxu1 %v989_v7  ;;  %v4057_v12 = vpop.f32.mrf.mxu0  ;;  %4084 = vmatprep.mubr.msk.f32.mxu1 %vm162_vm4, %v4529_v60 }
 0x622   :  { %4078 = vmatprep.subr.mxu1 %v988_v11 }
 0x623   :  { %4079 = vmatpush3.msra.mxu1 %v988_v11 }
 0x624   :  { %4080 = vmatprep.subr.mxu1 %v987_v13 }
 0x625   :  { %4081 = vmatpush3.msra.mxu1 %v987_v13 }
 0x626   :  { %4082 = vmatprep.subr.mxu1 %v986_v14 }
 0x627   :  { %4083 = vmatpush3.msra.mxu1 %v986_v14  ;;  %v4075_v15 = vpop.f32.mrf.mxu0 }
 0x628   :  { %4085 = vmatmul.mubr.msk.f32.vlgmr.msra.gmra.mxu1 %vm162_vm4, %v4533_v63  ;;  %4098 = vmatprep.subr.mxu1 %v4424_v16  ;;  %v983_v34 = vadd.f32 %v4075_v15, %v3708_v30 }
 0x629   :  { %4100 = vmatprep.mubr.msk.f32.mxu1 %vm4425_vm5, %v4424_v16  ;;  %v977_v18 = vpop.f32.mrf.mxu0 }
 0x62a   :  { %v978_v31 = vadd.f32 %v3708_v30, %v977_v18 }
 0x62f   :  { %v4097_v20 = vpop.f32.mrf.mxu0 }
 0x630   :  { %v1155_v21 = vadd.f32 %v4097_v20, %v3714_v19 }
 0x631   :  { %v1149_v22 = vpop.f32.mrf.mxu0 }
 0x632   :  { %v1150_v23 = vadd.f32 %v3714_v19, %v1149_v22 }
 0x634   :  { %4109 = vmatpush3.msra.mxu0 %v1150_v23 }
 0x635   :  { %4118 = vmatprep.subr.mxu0 %v1479_v59 }
 0x6e0   :  { %v4611_v24 = vpop.f32.mrf.mxu1 }
 0x6e1   :  { %v899_v4 = vadd.f32 %v4611_v24, %v3707_v3 }
 0x6e2   :  { %v4613_v25 = vpop.f32.mrf.mxu1 }
 0x6e3   :  { %v898_v6 = vadd.f32 %v3707_v3, %v4613_v25  ;;  %v1612_v25 = vld [vmem:[#allocation2 + $0x110] sm:$0xff] }
 0x6e8   :  { %v4086_v26 = vpop.f32.mrf.mxu1 }
 0x6e9   :  { %v1069_v32 = vadd.f32 %v4086_v26, %v3711_v27  ;;  %v1610_v26 = vld [vmem:[#allocation2 + $0x80] sm:$0xff] }
 0x6ea   :  { %v1063_v28 = vpop.f32.mrf.mxu1 }
 0x6eb   :  { %v1064_v29 = vadd.f32 %v3711_v27, %v1063_v28  ;;  %v1609_v27 = vld [vmem:[#allocation2 + $0x38] sm:$0xff] }
 0x6ed   :  { %4099 = vmatpush3.xpose.msk.msra.mxu1 %vm487_vm6, %v1064_v29 }
 0x6ee   :  { %4103 = vmatprep.subr.mxu1 %v4424_v16 }
 0x6f0   :  { %4101 = vmatmul.mubr.msk.f32.vlgmr.msra.gmra.mxu1 %vm487_vm6, %v978_v31 }
 0x6f1   :  { %4104 = vmatpush3.xpose.msk.msra.mxu1 %vm487_vm6, %v1069_v32  ;;  %4105 = vmatprep.mubr.msk.f32.mxu1 %vm4425_vm5, %v4424_v16 }
 0x6f2   :  { %4113 = vmatprep.subr.mxu1 %v4424_v16 }
 0x6f4   :  { %4106 = vmatmul.mubr.msk.f32.vlgmr.msra.gmra.mxu1 %vm487_vm6, %v983_v34 }
 0x6f5   :  { %4114 = vmatpush3.msra.mxu1 %v1155_v21  ;;  %4115 = vmatprep.mubr.msk.f32.mxu1 %vm4425_vm5, %v4424_v16 }
 0x6f6   :  { %4125 = vmatprep.subr.mxu1 %v1612_v25 }
 0x7b0   :  { %v1230_v35 = vpop.f32.mrf.mxu1 }
 0x7b1   :  { %v1231_v36 = vadd.f32 %v1230_v35, %v4576_v33 }
 0x7b2   :  { %v4102_v38 = vpop.f32.mrf.mxu1 }
 0x7b3   :  { %v1310_v39 = vsel %vm640_vm7, %v1231_v36, -inf }
 0x7b4   :  { %1311 = vmax.xlane.f32.xlu1 %v1310_v39  ;;  %v1306_v40 = vpop.f32.mrf.mxu1 }
 0x7b5   :  { %v1307_v17 = vadd.f32 %v1306_v40, %v4579_v37 }
 0x7b6   :  { %v4107_v41 = vpop.f32.mrf.mxu1 }
 0x7b7   :  { %v1313_v42 = vsel %vm640_vm7, %v1307_v17, -inf  ;;  %v3726_v41 = vld [vmem:[%s4865_s4 + $0xa] ss:$0 sm:$0xff] }
 0x7b8   :  { %1314 = vmax.xlane.f32.xlu1 %v1313_v42 }
 0x83d   :  { %v1312_v43 = vpop.xlane.xlu1 %1311 }
 0x83e   :  { %v1316_v44 = vsub.f32 %v1231_v36, %v1312_v43  ;;  %v3725_v36 = vld [vmem:[%s4865_s4 + $0x9] ss:$0 sm:$0xff] }
 0x840   :  { %v1318_v45 = vmul.f32 1.442695, %v1316_v44 }
 0x841   :  { %v1315_v46 = vpop.xlane.xlu1 %1314 }
 0x842   :  { %4346 = vpow2.f32 %v1318_v45  ;;  %v1317_v47 = vsub.f32 %v1307_v17, %v1315_v46  ;;  %v1726_v45 = vld [vmem:[#allocation2 + $0x238] sm:$0xff]  ;;  %v1725_v46 = vld [vmem:[#allocation2 + $0x1f0] sm:$0xff] }
 0x844   :  { %v1320_v48 = vmul.f32 1.442695, %v1317_v47  ;;  %v1724_v47 = vld [vmem:[#allocation2 + $0x1a8] sm:$0xff] }
 0x846   :  { %4348 = vpow2.f32 %v1320_v48  ;;  %v1723_v48 = vld [vmem:[#allocation2 + $0x160] sm:$0xff] }
 0x84f   :  { %v4347_v49 = vpop.eup %4346 }
 0x850   :  { %v1322_v50 = vsel %vm640_vm7, %v4347_v49, 0.0 }
 0x851   :  { %1323 = vadd.xlane.f32.xlu1 %v1322_v50  ;;  %v1721_v50 = vld [vmem:[#allocation2 + $0xd0] sm:$0xff] }
 0x853   :  { %v4349_v51 = vpop.eup %4348 }
 0x854   :  { %v1325_v52 = vsel %vm640_vm7, %v4349_v51, 0.0 }
 0x855   :  { %1326 = vadd.xlane.f32.xlu0 %v1325_v52  ;;  %v1719_v52 = vld [vmem:[#allocation2 + $0x40] sm:$0xff] }
 0x8da   :  { %v1324_v53 = vpop.xlane.xlu1 %1323 }
 0x8db   :  { %4350 = vrcp.f32 %v1324_v53  ;;  %v3727_v53 = vld [vmem:[%s4865_s4 + $0x7] ss:$0 sm:$0xff] }
 0x8de   :  { %v1327_v54 = vpop.xlane.xlu0 %1326 }
 0x8df   :  { %4352 = vrcp.f32 %v1327_v54 }
 0x8e8   :  { %v4351_v55 = vpop.eup %4350 }
 0x8e9   :  { %v1329_v56 = vmul.f32 %v4351_v55, %v4347_v49  ;;  %v1722_v49 = vld [vmem:[#allocation2 + $0x118] sm:$0xff] }
 0x8eb   :  { %4111 = vmatmul.mubr.msk.f32.vlgmr.msra.gmra.mxu0 %vm640_vm7, %v1329_v56 }
 0x8ec   :  { %v4353_v57 = vpop.eup %4352  ;;  %4119 = vmatpush3.msra.mxu0 %v1479_v59 }
 0x8ed   :  { %v1331_v58 = vmul.f32 %v4353_v57, %v4349_v51  ;;  %4120 = vmatprep.subr.mxu0 %v1478_v61  ;;  %v1720_v51 = vld [vmem:[#allocation2 + $0x88] sm:$0xff] }
 0x8ee   :  { %4121 = vmatpush3.msra.mxu0 %v1478_v61 }
 0x8ef   :  { %4116 = vmatmul.mubr.msk.f32.vlgmr.msra.gmra.mxu1 %vm640_vm7, %v1331_v58  ;;  %4136 = vmatprep.subr.mxu0 %v1726_v45 }
 0x8f0   :  { %4126 = vmatpush3.msra.mxu1 %v1612_v25 }
 0x9ab   :  { %v1401_v62 = vpop.f32.mrf.mxu0 }
 0x9ac   :  { %4122 = vmatprep.mubr.msk.f32.mxu0 %vm487_vm6, %v1401_v62 }
 0x9ad   :  { %v4112_v0 = vpop.f32.mrf.mxu0 }
 0x9af   :  { %v1474_v1 = vpop.f32.mrf.mxu1 }
 0x9b0   :  { %4123 = vmatmul.mubr.msk.f32.vlgmr.msra.gmra.mxu0 %vm487_vm6, %v1474_v1 }
 0x9b1   :  { %v4117_v2 = vpop.f32.mrf.mxu1  ;;  %4137 = vmatpush3.msra.mxu0 %v1726_v45 }
 0x9b2   :  { %4138 = vmatprep.subr.mxu0 %v1725_v46 }
 0x9b3   :  { %4139 = vmatpush3.msra.mxu0 %v1725_v46 }
 0x9b4   :  { %4140 = vmatprep.subr.mxu0 %v1724_v47 }
 0x9b5   :  { %4141 = vmatpush3.msra.mxu0 %v1724_v47 }
 0x9b6   :  { %4142 = vmatprep.subr.mxu0 %v1723_v48 }
 0x9b7   :  { %4143 = vmatpush3.msra.mxu0 %v1723_v48 }
 0x9b8   :  { %4144 = vmatprep.subr.mxu0 %v1722_v49 }
 0x9b9   :  { %4145 = vmatpush3.msra.mxu0 %v1722_v49 }
 0x9ba   :  { %4146 = vmatprep.subr.mxu0 %v1721_v50 }
 0x9bb   :  { %4147 = vmatpush3.msra.mxu0 %v1721_v50  ;;  %v3733_v50 = vld [vmem:[%s4865_s4 + $0xb] ss:$0 sm:$0xff] }
 0x9bc   :  { %4148 = vmatprep.subr.mxu0 %v1720_v51 }
 0x9bd   :  { %4149 = vmatpush3.msra.mxu0 %v1720_v51 }
 0x9be   :  { %4150 = vmatprep.subr.mxu0 %v1719_v52 }
 0x9bf   :  { %4151 = vmatpush3.msra.mxu0 %v1719_v52 }
 0xa70   :  { %v4124_v5 = vpop.f32.mrf.mxu0 }
 0xa71   :  { %v1562_v7 = vadd.f32 %v4124_v5, %v899_v4 }
 0xa72   :  { %v1552_v8 = vpop.f32.mrf.mxu0 }
 0xa73   :  { %v1561_v9 = vadd.f32 %v1552_v8, %v898_v6  ;;  %v1564_v10 = vadd.f32 %v1562_v7, %v4533_v63 }
 0xa75   :  { %v1570_v11 = vsel %vm162_vm4, %v1564_v10, 0.0  ;;  %v1563_v12 = vadd.f32 %v1561_v9, %v4529_v60  ;;  %v1611_v60 = vld [vmem:[#allocation2 + $0xc8] sm:$0xff] }
 0xa76   :  { %1571 = vadd.xlane.f32.xlu0 %v1570_v11  ;;  %4127 = vmatprep.subr.mxu1 %v1611_v60 }
 0xa77   :  { %v1567_v13 = vsel %vm162_vm4, %v1563_v12, 0.0  ;;  %4128 = vmatpush3.msra.mxu1 %v1611_v60 }
 0xa78   :  { %1568 = vadd.xlane.f32.xlu1 %v1567_v13  ;;  %4129 = vmatprep.subr.mxu1 %v1610_v26 }
 0xa79   :  { %4130 = vmatpush3.msra.mxu1 %v1610_v26 }
 0xa7a   :  { %4131 = vmatprep.subr.mxu1 %v1609_v27 }
 0xa7b   :  { %4132 = vmatpush3.msra.mxu1 %v1609_v27 }
 0xaff   :  { %v1572_v14 = vpop.xlane.xlu0 %1571 }
 0xb00   :  { %v1574_v15 = vmul.f32 0.03125, %v1572_v14  ;;  %v3730_v14 = vld [vmem:[%s4865_s4 + $0x8] ss:$0 sm:$0xff] }
 0xb01   :  { %v1569_v18 = vpop.xlane.xlu1 %1568 }
 0xb02   :  { %v1576_v19 = vsub.f32 %v1564_v10, %v1574_v15  ;;  %v1573_v20 = vmul.f32 0.03125, %v1569_v18 }
 0xb04   :  { %v1575_v21 = vsub.f32 %v1563_v12, %v1573_v20  ;;  %v1578_v22 = vmul.f32 %v1576_v19, %v1576_v19 }
 0xb06   :  { %v1582_v23 = vsel %vm162_vm4, %v1578_v22, 0.0  ;;  %v1577_v24 = vmul.f32 %v1575_v21, %v1575_v21 }
 0xb07   :  { %1583 = vadd.xlane.f32.xlu0 %v1582_v23 }
 0xb08   :  { %v1579_v63 = vsel %vm162_vm4, %v1577_v24, 0.0 }
 0xb09   :  { %1580 = vadd.xlane.f32.xlu1 %v1579_v63 }
 0xb90   :  { %v1584_v28 = vpop.xlane.xlu0 %1583 }
 0xb91   :  { %v1586_v29 = vmul.f32 0.03125, %v1584_v28 }
 0xb92   :  { %v1581_v30 = vpop.xlane.xlu1 %1580 }
 0xb93   :  { %v1588_v31 = vadd.f32 1e-12, %v1586_v29  ;;  %v1585_v32 = vmul.f32 0.03125, %v1581_v30 }
 0xb95   :  { %4354 = vrsqrt.f32 %v1588_v31  ;;  %v1587_v34 = vadd.f32 1e-12, %v1585_v32 }
 0xb97   :  { %4356 = vrsqrt.f32 %v1587_v34  ;;  %v1868_v34 = vld [vmem:[#allocation2 + $0x318] sm:$0xff] }
 0xb98   :  { %4155 = vmatprep.subr.mxu1 %v1868_v34 }
 0xba2   :  { %v4355_v35 = vpop.eup %4354 }
 0xba3   :  { %v1592_v38 = vmul.f32 %v4355_v35, %v1576_v19  ;;  %v2046_v35 = vld [vmem:[#allocation2 + $0x338] sm:$0xff] }
 0xba4   :  { %v4357_v39 = vpop.eup %4356  ;;  %4177 = vmatprep.subr.mxu0 %v2046_v35 }
 0xba5   :  { %v1591_v40 = vmul.f32 %v4357_v39, %v1575_v21  ;;  %v1600_v17 = vmul.f32 %v3725_v36, %v1592_v38  ;;  %v2045_v38 = vld [vmem:[#allocation2 + $0x2f0] sm:$0xff]  ;;  %v1866_v39 = vld [vmem:[#allocation2 + $0x288] sm:$0xff] }
 0xba7   :  { %v1599_v42 = vmul.f32 %v3725_v36, %v1591_v40  ;;  %v1608_v44 = vadd.f32 %v3726_v41, %v1600_v17  ;;  %v1867_v36 = vld [vmem:[#allocation2 + $0x2d0] sm:$0xff]  ;;  %v2044_v40 = vld [vmem:[#allocation2 + $0x2a8] sm:$0xff]  ;;  %v1865_v17 = vld [vmem:[#allocation2 + $0x240] sm:$0xff] }
 0xba9   :  { %v4658_v43 = vadd.f32 %v3726_v41, %v1599_v42  ;;  %v2043_v41 = vld [vmem:[#allocation2 + $0x260] sm:$0xff]  ;;  %v1960_v42 = vld [vmem:[#allocation2 + $0x328] sm:$0xff] }
 0xbab   :  { %4133 = vmatprep.mubr.msk.f32.mxu1 %vm162_vm4, %v4658_v43 }
 0xbac   :  { %4134 = vmatmul.mubr.msk.f32.vlgmr.msra.gmra.mxu1 %vm162_vm4, %v1608_v44 }
 0xbad   :  { %4156 = vmatpush3.msra.mxu1 %v1868_v34  ;;  %v2543_v34 = vld [vmem:[#allocation2 + $0x320] sm:$0xff] }
 0xbae   :  { %4157 = vmatprep.subr.mxu1 %v1867_v36 }
 0xbaf   :  { %4158 = vmatpush3.msra.mxu1 %v1867_v36 }
 0xbb0   :  { %4159 = vmatprep.subr.mxu1 %v1866_v39 }
 0xbb1   :  { %4160 = vmatpush3.msra.mxu1 %v1866_v39 }
 0xbb2   :  { %4161 = vmatprep.subr.mxu1 %v1865_v17 }
 0xbb3   :  { %4162 = vmatpush3.msra.mxu1 %v1865_v17 }
 0xbb4   :  { %4166 = vmatprep.subr.mxu1 %v1960_v42 }
 0xc6c   :  { %v4135_v54 = vpop.f32.mrf.mxu1 }
 0xc6d   :  { %v1698_v55 = vadd.f32 %v4135_v54, %v3727_v53 }
 0xc6e   :  { %v1692_v56 = vpop.f32.mrf.mxu1 }
 0xc6f   :  { %v1704_v57 = vmul.f32 0.044715, %v1698_v55  ;;  %v1693_v58 = vadd.f32 %v3727_v53, %v1692_v56  ;;  %v1702_v11 = vmul.f32 0.5, %v1698_v55 }
 0xc71   :  { %v1706_v59 = vmul.f32 %v1704_v57, %v1698_v55  ;;  %v1703_v61 = vmul.f32 0.044715, %v1693_v58  ;;  %v1701_v9 = vmul.f32 0.5, %v1693_v58 }
 0xc73   :  { %v1708_v62 = vmul.f32 %v1706_v59, %v1698_v55  ;;  %v1705_v0 = vmul.f32 %v1703_v61, %v1693_v58  ;;  %v1959_v59 = vld [vmem:[#allocation2 + $0x2e0] sm:$0xff]  ;;  %v1958_v61 = vld [vmem:[#allocation2 + $0x298] sm:$0xff] }
 0xc75   :  { %v1710_v1 = vadd.f32 %v1708_v62, %v1698_v55  ;;  %v1707_v2 = vmul.f32 %v1705_v0, %v1693_v58  ;;  %v3734_v55 = vld [vmem:[%s4865_s4 + $0xc] ss:$0 sm:$0xff]  ;;  %v1957_v62 = vld [vmem:[#allocation2 + $0x250] sm:$0xff] }
 0xc77   :  { %v1712_v3 = vmul.f32 0.7978846, %v1710_v1  ;;  %v1709_v4 = vadd.f32 %v1707_v2, %v1693_v58  ;;  %v3741_v2 = vld [vmem:[%s4865_s4 + $0xf] ss:$0 sm:$0xff] }
 0xc79   :  { %4358 = vtanh.f32 %v1712_v3  ;;  %v1711_v5 = vmul.f32 0.7978846, %v1709_v4 }
 0xc7b   :  { %4360 = vtanh.f32 %v1711_v5  ;;  %v3737_v5 = vld [vmem:[%s4865_s4 + $0xd] ss:$0 sm:$0xff] }
 0xc86   :  { %v4359_v6 = vpop.eup %4358 }
 0xc87   :  { %v1716_v8 = vadd.f32 1.0, %v4359_v6 }
 0xc88   :  { %v4361_v7 = vpop.eup %4360 }
 0xc89   :  { %v1715_v10 = vadd.f32 1.0, %v4361_v7  ;;  %v1718_v13 = vmul.f32 %v1716_v8, %v1702_v11  ;;  %v3745_v7 = vld [vmem:[%s4865_s4 + $0x11] ss:$0 sm:$0xff] }
 0xc8b   :  { %v1717_v12 = vmul.f32 %v1715_v10, %v1701_v9 }
 0xc8d   :  { %4152 = vmatprep.mubr.msk.f32.mxu0 %vm1734_vm8, %v1717_v12 }
 0xc8e   :  { %4153 = vmatmul.mubr.msk.f32.vlgmr.msra.gmra.mxu0 %vm1734_vm8, %v1718_v13 }
 0xc8f   :  { %4178 = vmatpush3.msra.mxu0 %v2046_v35  ;;  %v2450_v35 = vld [vmem:[#allocation2 + $0x2b8] sm:$0xff] }
 0xc90   :  { %4179 = vmatprep.subr.mxu0 %v2045_v38 }
 0xc91   :  { %4180 = vmatpush3.msra.mxu0 %v2045_v38 }
 0xc92   :  { %4181 = vmatprep.subr.mxu0 %v2044_v40 }
 0xc93   :  { %4182 = vmatpush3.msra.mxu0 %v2044_v40 }
 0xc94   :  { %4183 = vmatprep.subr.mxu0 %v2043_v41 }
 0xc95   :  { %4184 = vmatpush3.msra.mxu0 %v2043_v41  ;;  %v2542_v41 = vld [vmem:[#allocation2 + $0x2d8] sm:$0xff] }
 0xc96   :  { %4193 = vmatprep.subr.mxu0 %v4424_v16 }
 0xd4e   :  { %v4154_v15 = vpop.f32.mrf.mxu0 }
 0xd4f   :  { %v1813_v18 = vadd.f32 %v4154_v15, %v3730_v14 }
 0xd50   :  { %v1807_v19 = vpop.f32.mrf.mxu0 }
 0xd51   :  { %v1808_v20 = vadd.f32 %v3730_v14, %v1807_v19  ;;  %v1817_v21 = vadd.f32 %v1813_v18, %v1608_v44 }
 0xd53   :  { %v1823_v22 = vsel %vm162_vm4, %v1817_v21, 0.0  ;;  %v1816_v23 = vadd.f32 %v1808_v20, %v4658_v43 }
 0xd54   :  { %1824 = vadd.xlane.f32.xlu0 %v1823_v22 }
 0xd55   :  { %v1820_v24 = vsel %vm162_vm4, %v1816_v23, 0.0 }
 0xd56   :  { %1821 = vadd.xlane.f32.xlu1 %v1820_v24 }
 0xddd   :  { %v1825_v63 = vpop.xlane.xlu0 %1824 }
 0xdde   :  { %v1827_v25 = vmul.f32 0.03125, %v1825_v63 }
 0xddf   :  { %v1822_v60 = vpop.xlane.xlu1 %1821 }
 0xde0   :  { %v1829_v26 = vsub.f32 %v1817_v21, %v1827_v25  ;;  %v1826_v27 = vmul.f32 0.03125, %v1822_v60 }
 0xde2   :  { %v1828_v28 = vsub.f32 %v1816_v23, %v1826_v27  ;;  %v1831_v29 = vmul.f32 %v1829_v26, %v1829_v26 }
 0xde4   :  { %v1835_v30 = vsel %vm162_vm4, %v1831_v29, 0.0  ;;  %v1830_v31 = vmul.f32 %v1828_v28, %v1828_v28 }
 0xde5   :  { %1836 = vadd.xlane.f32.xlu0 %v1835_v30 }
 0xde6   :  { %v1832_v32 = vsel %vm162_vm4, %v1830_v31, 0.0 }
 0xde7   :  { %1833 = vadd.xlane.f32.xlu1 %v1832_v32 }
 0xe6e   :  { %v1837_v43 = vpop.xlane.xlu0 %1836 }
 0xe6f   :  { %v1839_v44 = vmul.f32 0.03125, %v1837_v43  ;;  %v2541_v43 = vld [vmem:[#allocation2 + $0x290] sm:$0xff] }
 0xe70   :  { %v1834_v45 = vpop.xlane.xlu1 %1833 }
 0xe71   :  { %v1841_v46 = vadd.f32 1e-12, %v1839_v44  ;;  %v1838_v47 = vmul.f32 0.03125, %v1834_v45  ;;  %v2540_v44 = vld [vmem:[#allocation2 + $0x248] sm:$0xff]  ;;  %v2715_v45 = vld [vmem:[#allocation2 + $0x340] sm:$0xff] }
 0xe73   :  { %4362 = vrsqrt.f32 %v1841_v46  ;;  %v1840_v48 = vadd.f32 1e-12, %v1838_v47  ;;  %v2714_v46 = vld [vmem:[#allocation2 + $0x2f8] sm:$0xff]  ;;  %v2713_v47 = vld [vmem:[#allocation2 + $0x2b0] sm:$0xff] }
 0xe75   :  { %4364 = vrsqrt.f32 %v1840_v48  ;;  %v2712_v48 = vld [vmem:[#allocation2 + $0x268] sm:$0xff] }
 0xe80   :  { %v4363_v49 = vpop.eup %4362 }
 0xe81   :  { %v1845_v51 = vmul.f32 %v4363_v49, %v1829_v26  ;;  %v2449_v49 = vld [vmem:[#allocation2 + $0x270] sm:$0xff] }
 0xe82   :  { %v4365_v52 = vpop.eup %4364 }
 0xe83   :  { %v1844_v53 = vmul.f32 %v4365_v52, %v1828_v28  ;;  %v1853_v54 = vmul.f32 %v3733_v50, %v1845_v51 }
 0xe85   :  { %v1852_v56 = vmul.f32 %v3733_v50, %v1844_v53  ;;  %v4685_v58 = vadd.f32 %v3734_v55, %v1853_v54  ;;  %v2629_v50 = vld [vmem:[#allocation2 + $0x330] sm:$0xff]  ;;  %v2628_v54 = vld [vmem:[#allocation2 + $0x2e8] sm:$0xff] }
 0xe87   :  { %v4683_v57 = vadd.f32 %v3734_v55, %v1852_v56  ;;  %v2627_v56 = vld [vmem:[#allocation2 + $0x2a0] sm:$0xff] }
 0xe89   :  { %4163 = vmatprep.mubr.msk.f32.mxu1 %vm162_vm4, %v4683_v57  ;;  %4185 = vmatprep.mubr.msk.f32.mxu0 %vm162_vm4, %v4683_v57 }
 0xe8a   :  { %4164 = vmatmul.mubr.msk.f32.vlgmr.msra.gmra.mxu1 %vm162_vm4, %v4685_v58  ;;  %4186 = vmatmul.mubr.msk.f32.vlgmr.msra.gmra.mxu0 %vm162_vm4, %v4685_v58 }
 0xe8b   :  { %4167 = vmatpush3.msra.mxu1 %v1960_v42  ;;  %4174 = vmatprep.mubr.msk.f32.mxu1 %vm162_vm4, %v4683_v57 }
 0xe8c   :  { %4168 = vmatprep.subr.mxu1 %v1959_v59  ;;  %4195 = vmatprep.mubr.msk.f32.mxu0 %vm4425_vm5, %v4424_v16 }
 0xe8d   :  { %4169 = vmatpush3.msra.mxu1 %v1959_v59  ;;  %v2626_v59 = vld [vmem:[#allocation2 + $0x258] sm:$0xff] }
 0xe8e   :  { %4170 = vmatprep.subr.mxu1 %v1958_v61 }
 0xe8f   :  { %4171 = vmatpush3.msra.mxu1 %v1958_v61 }
 0xe90   :  { %4172 = vmatprep.subr.mxu1 %v1957_v62 }
 0xe91   :  { %4173 = vmatpush3.msra.mxu1 %v1957_v62 }
 0xe92   :  { %4175 = vmatmul.mubr.msk.f32.vlgmr.msra.gmra.mxu1 %vm162_vm4, %v4685_v58  ;;  %4188 = vmatprep.subr.mxu1 %v4424_v16 }
 0xe93   :  { %4190 = vmatprep.mubr.msk.f32.mxu1 %vm4425_vm5, %v4424_v16 }
 0xf4a   :  { %v4165_v0 = vpop.f32.mrf.mxu1  ;;  %v4187_v3 = vpop.f32.mrf.mxu0 }
 0xf4b   :  { %v1954_v10 = vadd.f32 %v4165_v0, %v3737_v5  ;;  %v2126_v12 = vadd.f32 %v4187_v3, %v3745_v7  ;;  %v3766_v0 = vld [vmem:[%s4865_s4 + $0x12] ss:$0 sm:$0xff] }
 0xf4c   :  { %v1948_v1 = vpop.f32.mrf.mxu1  ;;  %v2120_v11 = vpop.f32.mrf.mxu0 }
 0xf4d   :  { %v1949_v13 = vadd.f32 %v3737_v5, %v1948_v1  ;;  %v2121_v14 = vadd.f32 %v3745_v7, %v2120_v11  ;;  %v3758_v11 = vld [vmem:[%s4865_s4 + $0xe] ss:$0 sm:$0xff] }
 0xf52   :  { %v4176_v4 = vpop.f32.mrf.mxu1 }
 0xf53   :  { %v2040_v6 = vadd.f32 %v4176_v4, %v3741_v2 }
 0xf54   :  { %v2034_v8 = vpop.f32.mrf.mxu1 }
 0xf55   :  { %v2035_v9 = vadd.f32 %v3741_v2, %v2034_v8  ;;  %4194 = vmatpush3.xpose.msk.msra.mxu0 %vm487_vm6, %v2040_v6  ;;  %v3762_v8 = vld [vmem:[%s4865_s4 + $0x10] ss:$0 sm:$0xff] }
 0xf56   :  { %4203 = vmatprep.subr.mxu0 %v4424_v16 }
 0xf57   :  { %4189 = vmatpush3.xpose.msk.msra.mxu1 %vm487_vm6, %v2035_v9 }
 0xf58   :  { %4196 = vmatmul.mubr.msk.f32.vlgmr.msra.gmra.mxu0 %vm487_vm6, %v1954_v10  ;;  %4198 = vmatprep.subr.mxu1 %v4424_v16 }
 0xf59   :  { %4204 = vmatpush3.msra.mxu0 %v2126_v12  ;;  %4205 = vmatprep.mubr.msk.f32.mxu0 %vm4425_vm5, %v4424_v16 }
 0xf5a   :  { %4191 = vmatmul.mubr.msk.f32.vlgmr.msra.gmra.mxu1 %vm487_vm6, %v1949_v13  ;;  %4215 = vmatprep.subr.mxu0 %v2543_v34 }
 0xf5b   :  { %4199 = vmatpush3.msra.mxu1 %v2121_v14  ;;  %4200 = vmatprep.mubr.msk.f32.mxu1 %vm4425_vm5, %v4424_v16 }
 0xf5c   :  { %4208 = vmatprep.subr.mxu1 %v2450_v35 }
0x1018   :  { %v2277_v15 = vpop.f32.mrf.mxu0 }
0x1019   :  { %v2278_v18 = vadd.f32 %v2277_v15, %v4579_v37 }
0x101a   :  { %v2201_v19 = vpop.f32.mrf.mxu1  ;;  %v4197_v20 = vpop.f32.mrf.mxu0 }
0x101b   :  { %v2202_v21 = vadd.f32 %v2201_v19, %v4576_v33  ;;  %v2284_v22 = vsel %vm640_vm7, %v2278_v18, -inf }
0x101c   :  { %2285 = vmax.xlane.f32.xlu0 %v2284_v22  ;;  %v4192_v23 = vpop.f32.mrf.mxu1 }
0x101d   :  { %v2281_v24 = vsel %vm640_vm7, %v2202_v21, -inf }
0x101e   :  { %2282 = vmax.xlane.f32.xlu1 %v2281_v24 }
0x10a5   :  { %v2286_v63 = vpop.xlane.xlu0 %2285 }
0x10a6   :  { %v2288_v25 = vsub.f32 %v2278_v18, %v2286_v63 }
0x10a7   :  { %v2283_v60 = vpop.xlane.xlu1 %2282 }
0x10a8   :  { %v2291_v26 = vmul.f32 1.442695, %v2288_v25  ;;  %v2287_v27 = vsub.f32 %v2202_v21, %v2283_v60 }
0x10aa   :  { %4366 = vpow2.f32 %v2291_v26  ;;  %v2289_v28 = vmul.f32 1.442695, %v2287_v27 }
0x10ac   :  { %4368 = vpow2.f32 %v2289_v28 }
0x10b7   :  { %v4367_v29 = vpop.eup %4366 }
0x10b8   :  { %v2296_v30 = vsel %vm640_vm7, %v4367_v29, 0.0 }
0x10b9   :  { %v4369_v31 = vpop.eup %4368  ;;  %2297 = vadd.xlane.f32.xlu0 %v2296_v30 }
0x10ba   :  { %v2293_v32 = vsel %vm640_vm7, %v4369_v31, 0.0 }
0x10bb   :  { %2294 = vadd.xlane.f32.xlu1 %v2293_v32 }
0x1142   :  { %v2298_v36 = vpop.xlane.xlu0 %2297 }
0x1143   :  { %4370 = vrcp.f32 %v2298_v36 }
0x1144   :  { %v2295_v38 = vpop.xlane.xlu1 %2294 }
0x1145   :  { %4372 = vrcp.f32 %v2295_v38  ;;  %v3119_v38 = vld [vmem:[#allocation2 + $0x348] sm:$0xff] }
0x1150   :  { %v4371_v39 = vpop.eup %4370 }
0x1151   :  { %v2302_v40 = vmul.f32 %v4371_v39, %v4367_v29  ;;  %v3118_v39 = vld [vmem:[#allocation2 + $0x300] sm:$0xff] }
0x1152   :  { %v4373_v17 = vpop.eup %4372 }
0x1153   :  { %4206 = vmatmul.mubr.msk.f32.vlgmr.msra.gmra.mxu0 %vm640_vm7, %v2302_v40  ;;  %v2300_v42 = vmul.f32 %v4373_v17, %v4369_v31 }
0x1154   :  { %4216 = vmatpush3.msra.mxu0 %v2543_v34  ;;  %4223 = vmatprep.mubr.msk.f32.mxu0 %vm162_vm4, %v4683_v57 }
0x1155   :  { %4217 = vmatprep.subr.mxu0 %v2542_v41  ;;  %4201 = vmatmul.mubr.msk.f32.vlgmr.msra.gmra.mxu1 %vm640_vm7, %v2300_v42 }
0x1156   :  { %4218 = vmatpush3.msra.mxu0 %v2542_v41  ;;  %4209 = vmatpush3.msra.mxu1 %v2450_v35 }
0x1157   :  { %4219 = vmatprep.subr.mxu0 %v2541_v43  ;;  %4210 = vmatprep.subr.mxu1 %v2449_v49 }
0x1158   :  { %4220 = vmatpush3.msra.mxu0 %v2541_v43  ;;  %4211 = vmatpush3.msra.mxu1 %v2449_v49  ;;  %v3756_v43 = vld [vmem:[%s4865_s4 + $0x13] ss:$0 sm:$0xff] }
0x1159   :  { %4221 = vmatprep.subr.mxu0 %v2540_v44  ;;  %4226 = vmatprep.subr.mxu1 %v2629_v50 }
0x115a   :  { %4222 = vmatpush3.msra.mxu0 %v2540_v44 }
0x115b   :  { %4224 = vmatmul.mubr.msk.f32.vlgmr.msra.gmra.mxu0 %vm162_vm4, %v4685_v58  ;;  %4237 = vmatprep.subr.mxu0 %v2715_v45 }
0x115c   :  { %4238 = vmatpush3.msra.mxu0 %v2715_v45  ;;  %4245 = vmatprep.mubr.msk.f32.mxu0 %vm162_vm4, %v4683_v57 }
0x115d   :  { %4239 = vmatprep.subr.mxu0 %v2714_v46 }
0x115e   :  { %4240 = vmatpush3.msra.mxu0 %v2714_v46 }
0x115f   :  { %4241 = vmatprep.subr.mxu0 %v2713_v47 }
0x1160   :  { %4242 = vmatpush3.msra.mxu0 %v2713_v47 }
0x1161   :  { %4243 = vmatprep.subr.mxu0 %v2712_v48 }
0x1162   :  { %4244 = vmatpush3.msra.mxu0 %v2712_v48 }
0x1163   :  { %4246 = vmatmul.mubr.msk.f32.vlgmr.msra.gmra.mxu0 %vm162_vm4, %v4685_v58  ;;  %4258 = vmatprep.subr.mxu0 %v4424_v16 }
0x1164   :  { %4260 = vmatprep.mubr.msk.f32.mxu0 %vm4425_vm5, %v4424_v16 }
0x1213   :  { %v2445_v51 = vpop.f32.mrf.mxu0 }
0x1215   :  { %v2372_v52 = vpop.f32.mrf.mxu1  ;;  %v4207_v53 = vpop.f32.mrf.mxu0 }
0x1216   :  { %4212 = vmatprep.mubr.msk.f32.mxu1 %vm487_vm6, %v2372_v52 }
0x1217   :  { %v4202_v55 = vpop.f32.mrf.mxu1  ;;  %4213 = vmatmul.mubr.msk.f32.vlgmr.msra.gmra.mxu1 %vm487_vm6, %v2445_v51 }
0x1218   :  { %4227 = vmatpush3.msra.mxu1 %v2629_v50  ;;  %4234 = vmatprep.mubr.msk.f32.mxu1 %vm162_vm4, %v4683_v57 }
0x1219   :  { %4228 = vmatprep.subr.mxu1 %v2628_v54 }
0x121a   :  { %4229 = vmatpush3.msra.mxu1 %v2628_v54 }
0x121b   :  { %4230 = vmatprep.subr.mxu1 %v2627_v56  ;;  %v4225_v61 = vpop.f32.mrf.mxu0 }
0x121c   :  { %4231 = vmatpush3.msra.mxu1 %v2627_v56  ;;  %v2623_v14 = vadd.f32 %v4225_v61, %v3758_v11 }
0x121d   :  { %4232 = vmatprep.subr.mxu1 %v2626_v59  ;;  %v2617_v62 = vpop.f32.mrf.mxu0 }
0x121e   :  { %4233 = vmatpush3.msra.mxu1 %v2626_v59  ;;  %v2618_v12 = vadd.f32 %v3758_v11, %v2617_v62 }
0x121f   :  { %4235 = vmatmul.mubr.msk.f32.vlgmr.msra.gmra.mxu1 %vm162_vm4, %v4685_v58  ;;  %4248 = vmatprep.subr.mxu1 %v4424_v16 }
0x1220   :  { %4250 = vmatprep.mubr.msk.f32.mxu1 %vm4425_vm5, %v4424_v16 }
0x1223   :  { %v4247_v1 = vpop.f32.mrf.mxu0 }
0x1224   :  { %v2795_v2 = vadd.f32 %v4247_v1, %v3766_v0 }
0x1225   :  { %v2789_v3 = vpop.f32.mrf.mxu0 }
0x1226   :  { %v2790_v4 = vadd.f32 %v3766_v0, %v2789_v3  ;;  %v3252_v3 = vld [vmem:[#allocation2 + $0x350] sm:$0xff] }
0x1228   :  { %4259 = vmatpush3.msra.mxu0 %v2790_v4  ;;  %v3250_v4 = vld [vmem:[#allocation2 + $0x2c0] sm:$0xff] }
0x1229   :  { %4268 = vmatprep.subr.mxu0 %v3119_v38 }
0x12d7   :  { %v4754_v5 = vpop.f32.mrf.mxu1 }
0x12d8   :  { %v2539_v44 = vadd.f32 %v4754_v5, %v3756_v43  ;;  %v3249_v5 = vld [vmem:[#allocation2 + $0x278] sm:$0xff] }
0x12d9   :  { %v4756_v6 = vpop.f32.mrf.mxu1 }
0x12da   :  { %v2538_v46 = vadd.f32 %v3756_v43, %v4756_v6 }
0x12df   :  { %v4236_v7 = vpop.f32.mrf.mxu1 }
0x12e0   :  { %v2709_v13 = vadd.f32 %v4236_v7, %v3762_v8 }
0x12e1   :  { %v2703_v9 = vpop.f32.mrf.mxu1 }
0x12e2   :  { %v2704_v10 = vadd.f32 %v3762_v8, %v2703_v9 }
0x12e4   :  { %4249 = vmatpush3.xpose.msk.msra.mxu1 %vm487_vm6, %v2704_v10 }
0x12e5   :  { %4253 = vmatprep.subr.mxu1 %v4424_v16 }
0x12e7   :  { %4251 = vmatmul.mubr.msk.f32.vlgmr.msra.gmra.mxu1 %vm487_vm6, %v2618_v12 }
0x12e8   :  { %4254 = vmatpush3.xpose.msk.msra.mxu1 %vm487_vm6, %v2709_v13  ;;  %4255 = vmatprep.mubr.msk.f32.mxu1 %vm4425_vm5, %v4424_v16  ;;  %v3779_v13 = vld [vmem:[%s4865_s4 + $0x16] ss:$0 sm:$0xff] }
0x12e9   :  { %4263 = vmatprep.subr.mxu1 %v4424_v16 }
0x12eb   :  { %4256 = vmatmul.mubr.msk.f32.vlgmr.msra.gmra.mxu1 %vm487_vm6, %v2623_v14 }
0x12ec   :  { %4264 = vmatpush3.msra.mxu1 %v2795_v2  ;;  %4265 = vmatprep.mubr.msk.f32.mxu1 %vm4425_vm5, %v4424_v16 }
0x12ed   :  { %4275 = vmatprep.subr.mxu1 %v3252_v3 }
0x13a7   :  { %v2870_v15 = vpop.f32.mrf.mxu1 }
0x13a8   :  { %v2871_v18 = vadd.f32 %v2870_v15, %v4576_v33 }
0x13a9   :  { %v4252_v19 = vpop.f32.mrf.mxu1 }
0x13aa   :  { %v2950_v20 = vsel %vm640_vm7, %v2871_v18, -inf }
0x13ab   :  { %2951 = vmax.xlane.f32.xlu1 %v2950_v20  ;;  %v2946_v21 = vpop.f32.mrf.mxu1  ;;  %v3780_v20 = vld [vmem:[%s4865_s4 + $0x17] ss:$0 sm:$0xff] }
0x13ac   :  { %v2947_v22 = vadd.f32 %v2946_v21, %v4579_v37 }
0x13ad   :  { %v4257_v23 = vpop.f32.mrf.mxu1 }
0x13ae   :  { %v2953_v24 = vsel %vm640_vm7, %v2947_v22, -inf }
0x13af   :  { %2954 = vmax.xlane.f32.xlu0 %v2953_v24  ;;  %v3366_v24 = vld [vmem:[#allocation2 + $0x478] sm:$0xff] }
0x1434   :  { %v2952_v63 = vpop.xlane.xlu1 %2951 }
0x1435   :  { %v2956_v25 = vsub.f32 %v2871_v18, %v2952_v63  ;;  %v3365_v63 = vld [vmem:[#allocation2 + $0x430] sm:$0xff] }
0x1437   :  { %v2958_v60 = vmul.f32 1.442695, %v2956_v25  ;;  %v3364_v25 = vld [vmem:[#allocation2 + $0x3e8] sm:$0xff] }
0x1438   :  { %v2955_v26 = vpop.xlane.xlu0 %2954 }
0x1439   :  { %4374 = vpow2.f32 %v2958_v60  ;;  %v2957_v16 = vsub.f32 %v2947_v22, %v2955_v26  ;;  %v3363_v60 = vld [vmem:[#allocation2 + $0x3a0] sm:$0xff]  ;;  %v3362_v26 = vld [vmem:[#allocation2 + $0x358] sm:$0xff] }
0x143b   :  { %v2960_v27 = vmul.f32 1.442695, %v2957_v16  ;;  %v3361_v16 = vld [vmem:[#allocation2 + $0x310] sm:$0xff] }
0x143d   :  { %4376 = vpow2.f32 %v2960_v27  ;;  %v3360_v27 = vld [vmem:[#allocation2 + $0x2c8] sm:$0xff] }
0x1446   :  { %v4375_v33 = vpop.eup %4374 }
0x1447   :  { %v2962_v28 = vsel %vm640_vm7, %v4375_v33, 0.0 }
0x1448   :  { %2963 = vadd.xlane.f32.xlu1 %v2962_v28  ;;  %v3782_v28 = vld [vmem:[%s4865_s4 + $0x14] ss:$0 sm:$0xff] }
0x144a   :  { %v4377_v29 = vpop.eup %4376 }
0x144b   :  { %v2965_v30 = vsel %vm640_vm7, %v4377_v29, 0.0 }
0x144c   :  { %2966 = vadd.xlane.f32.xlu0 %v2965_v30 }
0x14d1   :  { %v2964_v37 = vpop.xlane.xlu1 %2963 }
0x14d2   :  { %4378 = vrcp.f32 %v2964_v37 }
0x14d5   :  { %v2967_v31 = vpop.xlane.xlu0 %2966 }
0x14d6   :  { %4380 = vrcp.f32 %v2967_v31 }
0x14df   :  { %v4379_v32 = vpop.eup %4378 }
0x14e0   :  { %v2969_v34 = vmul.f32 %v4379_v32, %v4375_v33  ;;  %v3359_v33 = vld [vmem:[#allocation2 + $0x280] sm:$0xff] }
0x14e2   :  { %4261 = vmatmul.mubr.msk.f32.vlgmr.msra.gmra.mxu0 %vm640_vm7, %v2969_v34 }
0x14e3   :  { %v4381_v35 = vpop.eup %4380  ;;  %4269 = vmatpush3.msra.mxu0 %v3119_v38 }
0x14e4   :  { %v2971_v36 = vmul.f32 %v4381_v35, %v4377_v29  ;;  %4270 = vmatprep.subr.mxu0 %v3118_v39 }
0x14e5   :  { %4271 = vmatpush3.msra.mxu0 %v3118_v39 }
0x14e6   :  { %4266 = vmatmul.mubr.msk.f32.vlgmr.msra.gmra.mxu1 %vm640_vm7, %v2971_v36  ;;  %4286 = vmatprep.subr.mxu0 %v3366_v24 }
0x14e7   :  { %4276 = vmatpush3.msra.mxu1 %v3252_v3 }
0x15a2   :  { %v3041_v40 = vpop.f32.mrf.mxu0 }
0x15a3   :  { %4272 = vmatprep.mubr.msk.f32.mxu0 %vm487_vm6, %v3041_v40 }
0x15a4   :  { %v4262_v17 = vpop.f32.mrf.mxu0 }
0x15a6   :  { %v3114_v41 = vpop.f32.mrf.mxu1 }
0x15a7   :  { %4273 = vmatmul.mubr.msk.f32.vlgmr.msra.gmra.mxu0 %vm487_vm6, %v3114_v41 }
0x15a8   :  { %v4267_v42 = vpop.f32.mrf.mxu1  ;;  %4287 = vmatpush3.msra.mxu0 %v3366_v24 }
0x15a9   :  { %4288 = vmatprep.subr.mxu0 %v3365_v63 }
0x15aa   :  { %4289 = vmatpush3.msra.mxu0 %v3365_v63 }
0x15ab   :  { %4290 = vmatprep.subr.mxu0 %v3364_v25 }
0x15ac   :  { %4291 = vmatpush3.msra.mxu0 %v3364_v25  ;;  %v3792_v25 = vld [vmem:[%s4865_s4 + $0x19] ss:$0 sm:$0xff] }
0x15ad   :  { %4292 = vmatprep.subr.mxu0 %v3363_v60 }
0x15ae   :  { %4293 = vmatpush3.msra.mxu0 %v3363_v60 }
0x15af   :  { %4294 = vmatprep.subr.mxu0 %v3362_v26 }
0x15b0   :  { %4295 = vmatpush3.msra.mxu0 %v3362_v26 }
0x15b1   :  { %4296 = vmatprep.subr.mxu0 %v3361_v16 }
0x15b2   :  { %4297 = vmatpush3.msra.mxu0 %v3361_v16 }
0x15b3   :  { %4298 = vmatprep.subr.mxu0 %v3360_v27 }
0x15b4   :  { %4299 = vmatpush3.msra.mxu0 %v3360_v27  ;;  %v3592_v27 = vld [vmem:[%s4866_s5 + $0x38] sm:$0xff] }
0x15b5   :  { %4300 = vmatprep.subr.mxu0 %v3359_v33 }
0x15b6   :  { %4301 = vmatpush3.msra.mxu0 %v3359_v33  ;;  %v3591_v33 = vld [vmem:[%s4866_s5 + $0x28] sm:$0xff] }
0x1667   :  { %v4274_v45 = vpop.f32.mrf.mxu0 }
0x1668   :  { %v3202_v47 = vadd.f32 %v4274_v45, %v2539_v44 }
0x1669   :  { %v3192_v48 = vpop.f32.mrf.mxu0 }
0x166a   :  { %v3201_v49 = vadd.f32 %v3192_v48, %v2538_v46  ;;  %v3204_v50 = vadd.f32 %v3202_v47, %v4685_v58 }
0x166c   :  { %v3210_v51 = vsel %vm162_vm4, %v3204_v50, 0.0  ;;  %v3203_v52 = vadd.f32 %v3201_v49, %v4683_v57  ;;  %v3251_v57 = vld [vmem:[#allocation2 + $0x308] sm:$0xff] }
0x166d   :  { %3211 = vadd.xlane.f32.xlu0 %v3210_v51  ;;  %4277 = vmatprep.subr.mxu1 %v3251_v57  ;;  %v3786_v51 = vld [vmem:[%s4865_s4 + $0x15] ss:$0 sm:$0xff] }
0x166e   :  { %v3207_v53 = vsel %vm162_vm4, %v3203_v52, 0.0  ;;  %4278 = vmatpush3.msra.mxu1 %v3251_v57 }
0x166f   :  { %3208 = vadd.xlane.f32.xlu1 %v3207_v53  ;;  %4279 = vmatprep.subr.mxu1 %v3250_v4 }
0x1670   :  { %4280 = vmatpush3.msra.mxu1 %v3250_v4 }
0x1671   :  { %4281 = vmatprep.subr.mxu1 %v3249_v5 }
0x1672   :  { %4282 = vmatpush3.msra.mxu1 %v3249_v5 }
0x16f6   :  { %v3212_v54 = vpop.xlane.xlu0 %3211 }
0x16f7   :  { %v3214_v55 = vmul.f32 0.03125, %v3212_v54 }
0x16f8   :  { %v3209_v56 = vpop.xlane.xlu1 %3208 }
0x16f9   :  { %v3216_v59 = vsub.f32 %v3204_v50, %v3214_v55  ;;  %v3213_v61 = vmul.f32 0.03125, %v3209_v56 }
0x16fb   :  { %v3215_v62 = vsub.f32 %v3203_v52, %v3213_v61  ;;  %v3218_v0 = vmul.f32 %v3216_v59, %v3216_v59 }
0x16fd   :  { %v3222_v1 = vsel %vm162_vm4, %v3218_v0, 0.0  ;;  %v3217_v2 = vmul.f32 %v3215_v62, %v3215_v62 }
0x16fe   :  { %3223 = vadd.xlane.f32.xlu0 %v3222_v1 }
0x16ff   :  { %v3219_v58 = vsel %vm162_vm4, %v3217_v2, 0.0 }
0x1700   :  { %3220 = vadd.xlane.f32.xlu1 %v3219_v58 }
0x1787   :  { %v3224_v6 = vpop.xlane.xlu0 %3223 }
0x1788   :  { %v3226_v7 = vmul.f32 0.03125, %v3224_v6 }
0x1789   :  { %v3221_v8 = vpop.xlane.xlu1 %3220 }
0x178a   :  { %v3228_v9 = vadd.f32 1e-12, %v3226_v7  ;;  %v3225_v10 = vmul.f32 0.03125, %v3221_v8  ;;  %v3504_v8 = vld [vmem:[%s4866_s5 + $0x30] sm:$0xff] }
0x178b   :  { %4305 = vmatprep.subr.mxu1 %v3504_v8 }
0x178c   :  { %4382 = vrsqrt.f32 %v3228_v9  ;;  %v3227_v11 = vadd.f32 1e-12, %v3225_v10  ;;  %v3503_v9 = vld [vmem:[%s4866_s5 + $0x20] sm:$0xff]  ;;  %v3502_v10 = vld [vmem:[%s4866_s5 + $0x10] sm:$0xff] }
0x178e   :  { %4384 = vrsqrt.f32 %v3227_v11  ;;  %v3501_v11 = vld [vmem:[%s4866_s5] sm:$0xff] }
0x1799   :  { %v4383_v12 = vpop.eup %4382 }
0x179a   :  { %v3232_v14 = vmul.f32 %v4383_v12, %v3216_v59 }
0x179b   :  { %v4385_v15 = vpop.eup %4384 }
0x179c   :  { %v3231_v18 = vmul.f32 %v4385_v15, %v3215_v62  ;;  %v3240_v19 = vmul.f32 %v3779_v13, %v3232_v14 }
0x179e   :  { %v3239_v21 = vmul.f32 %v3779_v13, %v3231_v18  ;;  %v3248_v23 = vadd.f32 %v3780_v20, %v3240_v19 }
0x17a0   :  { %v3247_v22 = vadd.f32 %v3780_v20, %v3239_v21  ;;  %v3791_v21 = vld [vmem:[%s4865_s4 + $0x18] ss:$0 sm:$0xff] }
0x17a2   :  { %4283 = vmatprep.mubr.msk.f32.mxu1 %vm162_vm4, %v3247_v22 }
0x17a3   :  { %4284 = vmatmul.mubr.msk.f32.vlgmr.msra.gmra.mxu1 %vm162_vm4, %v3248_v23 }
0x17a4   :  { %4306 = vmatpush3.msra.mxu1 %v3504_v8 }
0x17a5   :  { %4307 = vmatprep.subr.mxu1 %v3503_v9 }
0x17a6   :  { %4308 = vmatpush3.msra.mxu1 %v3503_v9 }
0x17a7   :  { %4309 = vmatprep.subr.mxu1 %v3502_v10 }
0x17a8   :  { %4310 = vmatpush3.msra.mxu1 %v3502_v10 }
0x17a9   :  { %4311 = vmatprep.subr.mxu1 %v3501_v11 }
0x17aa   :  { %4312 = vmatpush3.msra.mxu1 %v3501_v11 }
0x17ab   :  { %4316 = vmatprep.subr.mxu1 %v3592_v27 }
0x1863   :  { %v4285_v29 = vpop.f32.mrf.mxu1 }
0x1864   :  { %v3338_v30 = vadd.f32 %v4285_v29, %v3782_v28  ;;  %v3589_v29 = vld [vmem:[%s4866_s5 + $0x8] sm:$0xff] }
0x1865   :  { %v3332_v37 = vpop.f32.mrf.mxu1 }
0x1866   :  { %v3344_v31 = vmul.f32 0.044715, %v3338_v30  ;;  %v3333_v32 = vadd.f32 %v3782_v28, %v3332_v37  ;;  %v3342_v48 = vmul.f32 0.5, %v3338_v30  ;;  %v3590_v28 = vld [vmem:[%s4866_s5 + $0x18] sm:$0xff] }
0x1868   :  { %v3346_v34 = vmul.f32 %v3344_v31, %v3338_v30  ;;  %v3343_v35 = vmul.f32 0.044715, %v3333_v32  ;;  %v3341_v46 = vmul.f32 0.5, %v3333_v32 }
0x186a   :  { %v3348_v36 = vmul.f32 %v3346_v34, %v3338_v30  ;;  %v3345_v38 = vmul.f32 %v3343_v35, %v3333_v32 }
0x186c   :  { %v3350_v39 = vadd.f32 %v3348_v36, %v3338_v30  ;;  %v3347_v40 = vmul.f32 %v3345_v38, %v3333_v32  ;;  %v3505_v30 = vld [vmem:[%s4866_s5 + $0x40] ss:$0 sm:$0xff]  ;;  %v3593_v38 = vld [vmem:[%s4866_s5 + $0x48] ss:$0 sm:$0xff] }
0x186e   :  { %v3352_v17 = vmul.f32 0.7978846, %v3350_v39  ;;  %v3349_v41 = vadd.f32 %v3347_v40, %v3333_v32 }
0x1870   :  { %4386 = vtanh.f32 %v3352_v17  ;;  %v3351_v42 = vmul.f32 0.7978846, %v3349_v41 }
0x1872   :  { %4388 = vtanh.f32 %v3351_v42 }
0x187d   :  { %v4387_v43 = vpop.eup %4386 }
0x187e   :  { %v3356_v45 = vadd.f32 1.0, %v4387_v43 }
0x187f   :  { %v4389_v44 = vpop.eup %4388 }
0x1880   :  { %v3355_v47 = vadd.f32 1.0, %v4389_v44  ;;  %v3358_v50 = vmul.f32 %v3356_v45, %v3342_v48 }
0x1882   :  { %v3357_v49 = vmul.f32 %v3355_v47, %v3341_v46 }
0x1884   :  { %4302 = vmatprep.mubr.msk.f32.mxu0 %vm1734_vm8, %v3357_v49 }
0x1885   :  { %4303 = vmatmul.mubr.msk.f32.vlgmr.msra.gmra.mxu0 %vm1734_vm8, %v3358_v50 }
0x1945   :  { %v4304_v52 = vpop.f32.mrf.mxu0 }
0x1946   :  { %v3452_v53 = vadd.f32 %v4304_v52, %v3786_v51 }
0x1947   :  { %v3446_v54 = vpop.f32.mrf.mxu0 }
0x1948   :  { %v3447_v55 = vadd.f32 %v3786_v51, %v3446_v54  ;;  %v3456_v56 = vadd.f32 %v3452_v53, %v3248_v23 }
0x194a   :  { %v3462_v59 = vsel %vm162_vm4, %v3456_v56, 0.0  ;;  %v3455_v61 = vadd.f32 %v3447_v55, %v3247_v22 }
0x194b   :  { %3463 = vadd.xlane.f32.xlu0 %v3462_v59 }
0x194c   :  { %v3459_v62 = vsel %vm162_vm4, %v3455_v61, 0.0 }
0x194d   :  { %3460 = vadd.xlane.f32.xlu1 %v3459_v62 }
0x19d4   :  { %v3464_v0 = vpop.xlane.xlu0 %3463 }
0x19d5   :  { %v3466_v1 = vmul.f32 0.03125, %v3464_v0 }
0x19d6   :  { %v3461_v2 = vpop.xlane.xlu1 %3460 }
0x19d7   :  { %v3468_v58 = vsub.f32 %v3456_v56, %v3466_v1  ;;  %v3465_v3 = vmul.f32 0.03125, %v3461_v2 }
0x19d9   :  { %v3467_v57 = vsub.f32 %v3455_v61, %v3465_v3  ;;  %v3470_v4 = vmul.f32 %v3468_v58, %v3468_v58 }
0x19db   :  { %v3474_v5 = vsel %vm162_vm4, %v3470_v4, 0.0  ;;  %v3469_v6 = vmul.f32 %v3467_v57, %v3467_v57 }
0x19dc   :  { %3475 = vadd.xlane.f32.xlu0 %v3474_v5 }
0x19dd   :  { %v3471_v7 = vsel %vm162_vm4, %v3469_v6, 0.0 }
0x19de   :  { %3472 = vadd.xlane.f32.xlu1 %v3471_v7 }
0x1a65   :  { %v3476_v12 = vpop.xlane.xlu0 %3475 }
0x1a66   :  { %v3478_v13 = vmul.f32 0.03125, %v3476_v12 }
0x1a67   :  { %v3473_v14 = vpop.xlane.xlu1 %3472 }
0x1a68   :  { %v3480_v15 = vadd.f32 1e-12, %v3478_v13  ;;  %v3477_v18 = vmul.f32 0.03125, %v3473_v14 }
0x1a6a   :  { %4390 = vrsqrt.f32 %v3480_v15  ;;  %v3479_v19 = vadd.f32 1e-12, %v3477_v18 }
0x1a6c   :  { %4392 = vrsqrt.f32 %v3479_v19 }
0x1a77   :  { %v4391_v20 = vpop.eup %4390 }
0x1a78   :  { %v3484_v22 = vmul.f32 %v4391_v20, %v3468_v58 }
0x1a79   :  { %v4393_v23 = vpop.eup %4392 }
0x1a7a   :  { %v3483_v24 = vmul.f32 %v4393_v23, %v3467_v57  ;;  %v3492_v63 = vmul.f32 %v3791_v21, %v3484_v22 }
0x1a7c   :  { %v3491_v60 = vmul.f32 %v3791_v21, %v3483_v24  ;;  %v3500_v16 = vadd.f32 %v3792_v25, %v3492_v63 }
0x1a7e   :  { %v3499_v26 = vadd.f32 %v3792_v25, %v3491_v60 }
0x1a80   :  { %4313 = vmatprep.mubr.msk.f32.mxu1 %vm162_vm4, %v3499_v26 }
0x1a81   :  { %4314 = vmatmul.mubr.msk.f32.vlgmr.msra.gmra.mxu1 %vm162_vm4, %v3500_v16 }
0x1a82   :  { %4317 = vmatpush3.msra.mxu1 %v3592_v27 }
0x1a83   :  { %4318 = vmatprep.subr.mxu1 %v3591_v33 }
0x1a84   :  { %4319 = vmatpush3.msra.mxu1 %v3591_v33 }
0x1a85   :  { %4320 = vmatprep.subr.mxu1 %v3590_v28 }
0x1a86   :  { %4321 = vmatpush3.msra.mxu1 %v3590_v28 }
0x1a87   :  { %4322 = vmatprep.subr.mxu1 %v3589_v29 }
0x1a88   :  { %4323 = vmatpush3.msra.mxu1 %v3589_v29 }
0x1b41   :  { %v4315_v37 = vpop.f32.mrf.mxu1 }
0x1b42   :  { %v3584_v31 = vadd.f32 %v4315_v37, %v3505_v30 }
0x1b43   :  { %v3578_v32 = vpop.f32.mrf.mxu1 }
0x1b44   :  { %v3579_v34 = vadd.f32 %v3578_v32, %v3505_v30 }
0x1b46   :  { %4394 = vtanh.f32 %v3579_v34 }
0x1b47   :  { %4396 = vtanh.f32 %v3584_v31 }
0x1b53   :  { %v4395_v35 = vpop.eup %4394 }
0x1b54   :  { %v4397_v36 = vpop.eup %4396  ;;  %4324 = vmatprep.mubr.msk.f32.mxu1 %vm162_vm4, %v4395_v35 }
0x1b55   :  { %4325 = vmatmul.mubr.msk.f32.vlgmr.msra.gmra.mxu1 %vm162_vm4, %v4397_v36 }
0x1c15   :  { %v4326_v39 = vpop.f32.mrf.mxu1 }
0x1c16   :  { %v3672_v40 = vadd.f32 %v4326_v39, %v3593_v38 }
0x1c17   :  { %v3666_v17 = vpop.f32.mrf.mxu1 }
0x1c18   :  { %3676 = vst [vmem:[%s4867_s6 + $0x8] sm:$0xff] %v3672_v40  ;;  %v3667_v41 = vadd.f32 %v3666_v17, %v3593_v38 }
0x1c1a   :  { %3675 = vst [vmem:[%s4867_s6] sm:$0xff] %v3667_v41 }
0x1c1b   :  { %3681 = vsyncpa [#allocation3], 1 }

</bundles_post_ra>
